<compile_context>
chip_gen: v6e
topology: v6e:2x2x1
jax: 0.10.0
libtpu: 0.0.40
codegen_flags: <defaults>
</compile_context>

<pallas_src>
import functools
import math

import jax
import jax.numpy as jnp
from jax import lax
from jax.experimental import pallas as pl
from jax.experimental.pallas import tpu as pltpu


def precompute_rope_params(head_dim, theta_base=10000.0, context_length=4096):
    assert head_dim % 2 == 0
    inv_freq = 1.0 / theta_base ** (
        jnp.arange(0, head_dim, 2, dtype=jnp.float32)[: head_dim // 2] / head_dim
    )
    positions = jnp.arange(context_length, dtype=jnp.float32)
    angles = positions[:, None] * inv_freq[None, :]
    angles = jnp.concatenate([angles, angles], axis=1)
    return jnp.cos(angles), jnp.sin(angles)


def transformer_block_kernel(
    x_ref, wqkv_ref, wo_ref, w12_ref, w3_ref, g1_ref, g2_ref,
    cos_ref, sin_ref, o_ref,
    q_sc, k_sc, v_sc, ctx_sc,
    *, num_heads, q_tile, eps, approx_recip,
):
    x = x_ref[...]                          # (T, D) f32
    T, D = x.shape
    nh = num_heads
    hd = D // nh
    half = hd // 2
    H = w3_ref.shape[0]
    mm_dtype = wqkv_ref.dtype
    TQ = TK = q_tile
    num_qt = T // TQ

    g1 = g1_ref[...]                        # (1, D)
    g2 = g2_ref[...]                        # (1, D)
    cos = cos_ref[...]                      # (T, hd) f32
    sin = sin_ref[...]                      # (T, hd) f32

    # rotate_half(t) == pltpu.roll(t, half) * sign; fold the sign into sin once.
    lane = lax.broadcasted_iota(jnp.int32, (1, hd), 1)
    sin_signed = jnp.where(lane < half, -sin, sin)          # (T, hd)

    # ---- norm1 (RMSNorm, f32) ----
    ms = jnp.mean(x * x, axis=-1, keepdims=True)
    xn = x * lax.rsqrt(ms + eps) * g1

    # ---- fused QKV projection: one (T,D) x (D,3D) MXU pass ----
    qkv = jnp.dot(xn.astype(mm_dtype), wqkv_ref[...],
                  preferred_element_type=jnp.float32)       # (T, 3D) f32
    q = qkv[:, :D]
    k = qkv[:, D:2 * D]
    v = qkv[:, 2 * D:]

    # ---- head-major layout: (T, nh, hd) -> (nh, T, hd) ----
    qh = pltpu.einshape("thd->htd", q.reshape(T, nh, hd))
    kh = pltpu.einshape("thd->htd", k.reshape(T, nh, hd))
    vh = pltpu.einshape("thd->htd", v.reshape(T, nh, hd))

    def rope(t):                            # (nh, T, hd) f32
        return t * cos[None] + pltpu.roll(t, shift=half, axis=2) * sin_signed[None]

    scale = 1.0 / math.sqrt(hd)
    q_sc[...] = (rope(qh) * scale).astype(mm_dtype)         # pre-scaled queries
    k_sc[...] = rope(kh).astype(mm_dtype)
    v_sc[...] = vh.astype(mm_dtype)

    # Causal bias for the diagonal (TQ, TK) tile only (finite, no -inf).
    r = lax.broadcasted_iota(jnp.int32, (TQ, TK), 0)
    c = lax.broadcasted_iota(jnp.int32, (TQ, TK), 1)
    diag_bias = jnp.where(c <= r, 0.0, -1e30).astype(jnp.float32)

    # ---- flash attention: query-tile loop, online softmax over KV tiles ----
    @pl.loop(0, num_qt)
    def _(qt):
        q_start = pl.multiple_of(qt * TQ, TQ)
        q_t = q_sc[:, pl.ds(q_start, TQ), :]                # (nh, TQ, hd)

        def attend(kt, carry, *, masked):
            m, l, acc = carry
            k_start = pl.multiple_of(kt * TK, TK)
            k_t = k_sc[:, pl.ds(k_start, TK), :]
            v_t = v_sc[:, pl.ds(k_start, TK), :]
            s = jnp.einsum("hqd,hkd->hqk", q_t, k_t,
                           preferred_element_type=jnp.float32)   # (nh, TQ, TK)
            if masked:
                s = s + diag_bias[None]
            m_new = jnp.maximum(m, s.max(-1, keepdims=True))
            alpha = jnp.exp(m - m_new)
            p = jnp.exp(s - m_new)                           # unnormalized
            l_new = alpha * l + p.sum(-1, keepdims=True)
            acc_new = alpha * acc + jnp.einsum(
                "hqk,hkd->hqd", p.astype(mm_dtype), v_t,
                preferred_element_type=jnp.float32)
            return m_new, l_new, acc_new

        init = (jnp.full((nh, TQ, 1), -1e30, jnp.float32),
                jnp.zeros((nh, TQ, 1), jnp.float32),
                jnp.zeros((nh, TQ, hd), jnp.float32))
        # Causal block skipping: tiles strictly below the diagonal (unmasked),
        # then one masked diagonal tile.  Tiles above the diagonal are skipped.
        carry = lax.fori_loop(0, qt, functools.partial(attend, masked=False), init)
        _, l_f, acc_f = attend(qt, carry, masked=True)

        # Deferred normalization: one scale of the (nh, TQ, hd) accumulator.
        inv_l = pl.reciprocal(l_f, approx=approx_recip)
        ctx_t = acc_f * inv_l
        ctx_sc[pl.ds(q_start, TQ), :] = (
            pltpu.einshape("htd->thd", ctx_t).reshape(TQ, D).astype(ctx_sc.dtype))

    # ---- output projection + first residual ----
    attn_out = jnp.dot(ctx_sc[...], wo_ref[...],
                       preferred_element_type=jnp.float32)  # (T, D)
    h1 = x + attn_out

    # ---- norm2 (RMSNorm, f32) ----
    ms2 = jnp.mean(h1 * h1, axis=-1, keepdims=True)
    hn = h1 * lax.rsqrt(ms2 + eps) * g2

    # ---- feed-forward (SwiGLU), W1|W2 fused into one (D, 2H) matmul ----
    ab = jnp.dot(hn.astype(mm_dtype), w12_ref[...],
                 preferred_element_type=jnp.float32)        # (T, 2H)
    a = ab[:, :H]
    b = ab[:, H:]
    ff = jnp.dot((a * jax.nn.sigmoid(a) * b).astype(mm_dtype), w3_ref[...],
                 preferred_element_type=jnp.float32)        # (T, D)

    o_ref[...] = (h1 + ff).astype(o_ref.dtype)


def fuse_block_params(params, matmul_dtype=jnp.bfloat16):
    """Pre-fuse and pre-cast weights ONCE (outside the per-call path)."""
    return {
        "wqkv": jnp.concatenate(
            [params["wq"], params["wk"], params["wv"]], axis=1).astype(matmul_dtype),
        "wo": params["wo"].astype(matmul_dtype),
        "w12": jnp.concatenate(
            [params["w1"], params["w2"]], axis=1).astype(matmul_dtype),
        "w3": params["w3"].astype(matmul_dtype),
        "g1": params["g1"].astype(jnp.float32),
        "g2": params["g2"].astype(jnp.float32),
    }


def _pick_vmem_limit(requested_bytes):
    # Per-generation cap: 85% of physical VMEM (leaves Mosaic internal-scratch
    # headroom): ~54 MiB on v7x, ~109 MiB on v5e/v6e.
    try:
        phys = int(pltpu.get_tpu_info().vmem_capacity_bytes)
    except Exception:
        phys = 64 << 20          # conservative (v7x per-TensorCore)
    cap = int(phys * 0.85)
    return max(min(int(requested_bytes), cap), 32 << 20)


def transformer_block(x, fused, *, num_heads, eps=1e-5, q_tile=None,
                      approx_recip=True, out_dtype=None):
    B, T, D = x.shape
    head_dim = D // num_heads
    H = fused["w3"].shape[0]
    mm_dtype = fused["wqkv"].dtype
    out_dtype = x.dtype if out_dtype is None else out_dtype

    if q_tile is None:
        q_tile = T if T <= 256 else 128
    assert T % q_tile == 0, "sequence length must be a multiple of the query tile"

    cos, sin = precompute_rope_params(head_dim, context_length=T)

    kernel = functools.partial(
        transformer_block_kernel,
        num_heads=num_heads, q_tile=q_tile, eps=eps, approx_recip=approx_recip)

    full = lambda shape: pl.BlockSpec(shape, lambda b: tuple(0 for _ in shape))

    itemsize = jnp.dtype(mm_dtype).itemsize
    weight_bytes = (sum(int(v.size) * v.dtype.itemsize for v in fused.values())
                    + (int(cos.size) + int(sin.size)) * 4)
    act_bytes = (
        2 * 2 * T * D * 4                              # x in + out, double-buffered
        + T * 3 * D * 4                                # qkv (f32)
        + 4 * T * D * itemsize                         # q/k/v/ctx scratch
        + 3 * num_heads * q_tile * q_tile * 4          # per-tile scores / probs / acc
        + T * 2 * H * 4                                # SwiGLU activation
        + 4 * T * D * 4                                # residual / norm temporaries
    )
    vmem_limit = _pick_vmem_limit(2 * weight_bytes + act_bytes + (4 << 20))

    return pl.pallas_call(
        kernel,
        out_shape=jax.ShapeDtypeStruct((B, T, D), out_dtype),
        grid_spec=pltpu.PrefetchScalarGridSpec(
            num_scalar_prefetch=0,
            grid=(B,),
            in_specs=[
                pl.BlockSpec((pl.Squeezed(), T, D), lambda b: (b, 0, 0)),  # x
                full((D, 3 * D)),              # fused Wq|Wk|Wv
                full((D, D)),                  # Wo
                full((D, 2 * H)),              # fused W1|W2
                full((H, D)),                  # W3
                full((1, D)), full((1, D)),    # norm1 / norm2 weight
                full((T, head_dim)), full((T, head_dim)),  # cos, sin
            ],
            out_specs=pl.BlockSpec((pl.Squeezed(), T, D), lambda b: (b, 0, 0)),
            scratch_shapes=[
                pltpu.VMEM((num_heads, T, head_dim), mm_dtype),   # q (RoPE'd, scaled)
                pltpu.VMEM((num_heads, T, head_dim), mm_dtype),   # k (RoPE'd)
                pltpu.VMEM((num_heads, T, head_dim), mm_dtype),   # v
                pltpu.VMEM((T, D), mm_dtype),                     # ctx
            ],
        ),
        compiler_params=pltpu.CompilerParams(
            dimension_semantics=("parallel",),
            vmem_limit_bytes=vmem_limit,
        ),
    )(x, fused["wqkv"], fused["wo"], fused["w12"], fused["w3"],
      fused["g1"], fused["g2"], cos, sin)


def reference_block(x, params, *, num_heads):
    # Pure-JAX reference mirroring the PyTorch forward.
    B, T, D = x.shape
    head_dim = D // num_heads
    cos, sin = precompute_rope_params(head_dim, context_length=T)
    eps = 1e-5

    def rms(v, g):
        ms = jnp.mean(v * v, axis=-1, keepdims=True)
        return v * lax.rsqrt(ms + eps) * g

    def rope(xh):  # (B, nH, T, hd)
        half = head_dim // 2
        x1, x2 = xh[..., :half], xh[..., half:]
        rot = jnp.concatenate([-x2, x1], axis=-1)
        return xh * cos[None, None] + rot * sin[None, None]

    xn = rms(x, params["g1"][0])
    q = xn @ params["wq"]
    k = xn @ params["wk"]
    v = xn @ params["wv"]

    def split(t):
        return t.reshape(B, T, num_heads, head_dim).transpose(0, 2, 1, 3)

    q, k, v = rope(split(q)), rope(split(k)), split(v)
    s = jnp.einsum("bhqd,bhkd->bhqk", q, k)
    mask = jnp.triu(jnp.ones((T, T), bool), k=1)
    s = jnp.where(mask[None, None], -jnp.inf, s)
    p = jax.nn.softmax(s / math.sqrt(head_dim), axis=-1)
    ctx = jnp.einsum("bhqk,bhkd->bhqd", p, v).transpose(0, 2, 1, 3).reshape(B, T, D)
    h1 = x + ctx @ params["wo"]
    hn = rms(h1, params["g2"][0])
    a = hn @ params["w1"]
    b2 = hn @ params["w2"]
    return h1 + (a * jax.nn.sigmoid(a) * b2) @ params["w3"]


if __name__ == "__main__":
    B, T, D, n_heads, H = 2, 16, 64, 4, 128
    key = jax.random.PRNGKey(0)
    keys = jax.random.split(key, 8)
    scale = 0.1
    # Linear weights stored already transposed to (in, out) for x @ W.
    params = {
        "wq": scale * jax.random.normal(keys[0], (D, D), jnp.float32),
        "wk": scale * jax.random.normal(keys[1], (D, D), jnp.float32),
        "wv": scale * jax.random.normal(keys[2], (D, D), jnp.float32),
        "wo": scale * jax.random.normal(keys[3], (D, D), jnp.float32),
        "w1": scale * jax.random.normal(keys[4], (D, H), jnp.float32),
        "w2": scale * jax.random.normal(keys[5], (D, H), jnp.float32),
        "w3": scale * jax.random.normal(keys[6], (H, D), jnp.float32),
        "g1": jnp.ones((1, D), jnp.float32),
        "g2": jnp.ones((1, D), jnp.float32),
    }
    x = jax.random.normal(keys[7], (B, T, D), jnp.float32)

    ref = reference_block(x, params, num_heads=n_heads)

    # f32 debug path (exact reciprocal): tight check against the f32 reference.
    fused_f32 = fuse_block_params(params, matmul_dtype=jnp.float32)
    out_f32 = jax.block_until_ready(
        transformer_block(x, fused_f32, num_heads=n_heads, approx_recip=False))
    assert out_f32.shape == (B, T, D)
    assert jnp.allclose(out_f32, ref, atol=2e-3, rtol=2e-3), "f32 mismatch vs reference"

    # Default bf16 MXU path (the performance path), jitted, weights pre-fused once.
    fused_bf16 = fuse_block_params(params)           # bf16 by default
    block_bf16 = jax.jit(functools.partial(transformer_block, num_heads=n_heads))
    out_bf16 = jax.block_until_ready(block_bf16(x, fused_bf16))
    assert out_bf16.shape == (B, T, D)
    assert jnp.allclose(out_bf16, ref, atol=1e-1, rtol=1e-1), "bf16 mismatch vs reference"

    print("KERNEL_OK")
</pallas_src>

<mosaic_0001>
module attributes {stable_mosaic.version = 11 : i64} {
  func.func @transformer_block_kernel(%arg0: i32, %arg1: memref<1x16x64xf32, #tpu.memory_space<vmem>>, %arg2: memref<64x192xf32, #tpu.memory_space<vmem>>, %arg3: memref<64x64xf32, #tpu.memory_space<vmem>>, %arg4: memref<64x256xf32, #tpu.memory_space<vmem>>, %arg5: memref<128x64xf32, #tpu.memory_space<vmem>>, %arg6: memref<1x64xf32, #tpu.memory_space<vmem>>, %arg7: memref<1x64xf32, #tpu.memory_space<vmem>>, %arg8: memref<16x16xf32, #tpu.memory_space<vmem>>, %arg9: memref<16x16xf32, #tpu.memory_space<vmem>>, %arg10: memref<1x16x64xf32, #tpu.memory_space<vmem>>, %arg11: memref<4x16x16xf32, #tpu.memory_space<vmem>>, %arg12: memref<4x16x16xf32, #tpu.memory_space<vmem>>, %arg13: memref<4x16x16xf32, #tpu.memory_space<vmem>>, %arg14: memref<16x64xf32, #tpu.memory_space<vmem>>) attributes {dimension_semantics = [#tpu.dimension_semantics<parallel>], iteration_bounds = array<i64: 2>, scalar_prefetch = 0 : i64, scratch_operands = 4 : i64, tpu.core_type = #tpu.core_type<tc>, window_params = [{transform_indices = @transform_0, window_bounds = array<i64: 1, 16, 64>}, {pipeline_mode = #tpu.pipeline_mode<synchronous>, transform_indices = @transform_1, window_bounds = array<i64: 64, 192>}, {pipeline_mode = #tpu.pipeline_mode<synchronous>, transform_indices = @transform_2, window_bounds = array<i64: 64, 64>}, {pipeline_mode = #tpu.pipeline_mode<synchronous>, transform_indices = @transform_3, window_bounds = array<i64: 64, 256>}, {pipeline_mode = #tpu.pipeline_mode<synchronous>, transform_indices = @transform_4, window_bounds = array<i64: 128, 64>}, {pipeline_mode = #tpu.pipeline_mode<synchronous>, transform_indices = @transform_5, window_bounds = array<i64: 1, 64>}, {pipeline_mode = #tpu.pipeline_mode<synchronous>, transform_indices = @transform_6, window_bounds = array<i64: 1, 64>}, {pipeline_mode = #tpu.pipeline_mode<synchronous>, transform_indices = @transform_7, window_bounds = array<i64: 16, 16>}, {pipeline_mode = #tpu.pipeline_mode<synchronous>, transform_indices = @transform_8, window_bounds = array<i64: 16, 16>}, {transform_indices = @transform_9, window_bounds = array<i64: 1, 16, 64>}]} {
    %c0 = arith.constant 0 : index
    %c0_0 = arith.constant 0 : index
    %c0_1 = arith.constant 0 : index
    %0 = vector.load %arg1[%c0, %c0_0, %c0_1] : memref<1x16x64xf32, #tpu.memory_space<vmem>>, vector<1x16x64xf32>
    %1 = vector.shape_cast %0 : vector<1x16x64xf32> to vector<16x64xf32>
    %c0_2 = arith.constant 0 : index
    %c0_3 = arith.constant 0 : index
    %2 = vector.load %arg6[%c0_2, %c0_3] : memref<1x64xf32, #tpu.memory_space<vmem>>, vector<1x64xf32>
    %c0_4 = arith.constant 0 : index
    %c0_5 = arith.constant 0 : index
    %3 = vector.load %arg7[%c0_4, %c0_5] : memref<1x64xf32, #tpu.memory_space<vmem>>, vector<1x64xf32>
    %c0_6 = arith.constant 0 : index
    %c0_7 = arith.constant 0 : index
    %4 = vector.load %arg8[%c0_6, %c0_7] : memref<16x16xf32, #tpu.memory_space<vmem>>, vector<16x16xf32>
    %c0_8 = arith.constant 0 : index
    %c0_9 = arith.constant 0 : index
    %5 = vector.load %arg9[%c0_8, %c0_9] : memref<16x16xf32, #tpu.memory_space<vmem>>, vector<16x16xf32>
    %6 = tpu.iota {dimensions = array<i32: 1>} : vector<1x16xi32>
    %c8_i32 = arith.constant 8 : i32
    %7 = vector.broadcast %c8_i32 : i32 to vector<1x16xi32>
    %8 = arith.cmpi slt, %6, %7 : vector<1x16xi32>
    %cst = arith.constant 0.000000e+00 : f32
    %9 = vector.broadcast %cst : f32 to vector<16x16xf32>
    %10 = arith.subf %9, %5 : vector<16x16xf32>
    %11 = vector.shape_cast %8 : vector<1x16xi1> to vector<1x16xi1>
    %12 = vector.broadcast %11 : vector<1x16xi1> to vector<16x16xi1>
    %13 = arith.select %12, %10, %5 : vector<16x16xi1>, vector<16x16xf32>
    %14 = arith.mulf %1, %1 : vector<16x64xf32>
    %cst_10 = arith.constant dense<0.000000e+00> : vector<16xf32>
    %15 = vector.multi_reduction <add>, %14, %cst_10 [1] : vector<16x64xf32> to vector<16xf32>
    %16 = vector.shape_cast %15 : vector<16xf32> to vector<16x1xf32>
    %cst_11 = arith.constant 6.400000e+01 : f32
    %17 = vector.broadcast %cst_11 : f32 to vector<16x1xf32>
    %18 = arith.divf %16, %17 : vector<16x1xf32>
    %cst_12 = arith.constant 9.99999974E-6 : f32
    %19 = vector.broadcast %cst_12 : f32 to vector<16x1xf32>
    %20 = arith.addf %18, %19 : vector<16x1xf32>
    %21 = math.rsqrt %20 : vector<16x1xf32>
    %22 = vector.broadcast %21 : vector<16x1xf32> to vector<16x64xf32>
    %23 = arith.mulf %1, %22 : vector<16x64xf32>
    %24 = vector.broadcast %2 : vector<1x64xf32> to vector<16x64xf32>
    %25 = arith.mulf %23, %24 : vector<16x64xf32>
    %c0_13 = arith.constant 0 : index
    %c0_14 = arith.constant 0 : index
    %26 = vector.load %arg2[%c0_13, %c0_14] : memref<64x192xf32, #tpu.memory_space<vmem>>, vector<64x192xf32>
    %cst_15 = arith.constant dense<0.000000e+00> : vector<16x192xf32>
    %27 = tpu.matmul %25, %26, %cst_15 {dimension_numbers = #tpu.dot_dimension_numbers<[1], [0], [0], [1], [0, 0, 1, 1], [], []>} : vector<16x64xf32>, vector<64x192xf32>, vector<16x192xf32> -> vector<16x192xf32>
    %28 = vector.extract_strided_slice %27 {offsets = [0, 0], sizes = [16, 64], strides = [1, 1]} : vector<16x192xf32> to vector<16x64xf32>
    %29 = vector.extract_strided_slice %27 {offsets = [0, 64], sizes = [16, 64], strides = [1, 1]} : vector<16x192xf32> to vector<16x64xf32>
    %30 = vector.extract_strided_slice %27 {offsets = [0, 128], sizes = [16, 64], strides = [1, 1]} : vector<16x192xf32> to vector<16x64xf32>
    %31 = vector.shape_cast %28 : vector<16x64xf32> to vector<16x4x16xf32>
    %32 = tpu.transpose %31, [1, 0, 2] : vector<16x4x16xf32> -> vector<4x16x16xf32>
    %33 = vector.shape_cast %29 : vector<16x64xf32> to vector<16x4x16xf32>
    %34 = tpu.transpose %33, [1, 0, 2] : vector<16x4x16xf32> -> vector<4x16x16xf32>
    %35 = vector.shape_cast %30 : vector<16x64xf32> to vector<16x4x16xf32>
    %36 = tpu.transpose %35, [1, 0, 2] : vector<16x4x16xf32> -> vector<4x16x16xf32>
    %37 = vector.shape_cast %4 : vector<16x16xf32> to vector<1x16x16xf32>
    %38 = vector.broadcast %37 : vector<1x16x16xf32> to vector<4x16x16xf32>
    %39 = arith.mulf %32, %38 : vector<4x16x16xf32>
    %c8_i32_16 = arith.constant 8 : i32
    %40 = tpu.dynamic_rotate %32 by %c8_i32_16 dim 2 : vector<4x16x16xf32>, i32 -> vector<4x16x16xf32>
    %41 = vector.shape_cast %13 : vector<16x16xf32> to vector<1x16x16xf32>
    %42 = vector.broadcast %41 : vector<1x16x16xf32> to vector<4x16x16xf32>
    %43 = arith.mulf %40, %42 : vector<4x16x16xf32>
    %44 = arith.addf %39, %43 : vector<4x16x16xf32>
    %cst_17 = arith.constant 2.500000e-01 : f32
    %45 = vector.broadcast %cst_17 : f32 to vector<4x16x16xf32>
    %46 = arith.mulf %44, %45 : vector<4x16x16xf32>
    %c0_18 = arith.constant 0 : index
    %c0_19 = arith.constant 0 : index
    %c0_20 = arith.constant 0 : index
    %47 = vector.load %arg11[%c0_18, %c0_19, %c0_20] : memref<4x16x16xf32, #tpu.memory_space<vmem>>, vector<4x16x16xf32>
    tpu.vector_store %arg11[%c0_18, %c0_19, %c0_20], %46 {strides = array<i32>} : memref<4x16x16xf32, #tpu.memory_space<vmem>>, vector<4x16x16xf32>,
    %48 = vector.shape_cast %4 : vector<16x16xf32> to vector<1x16x16xf32>
    %49 = vector.broadcast %48 : vector<1x16x16xf32> to vector<4x16x16xf32>
    %50 = arith.mulf %34, %49 : vector<4x16x16xf32>
    %c8_i32_21 = arith.constant 8 : i32
    %51 = tpu.dynamic_rotate %34 by %c8_i32_21 dim 2 : vector<4x16x16xf32>, i32 -> vector<4x16x16xf32>
    %52 = vector.shape_cast %13 : vector<16x16xf32> to vector<1x16x16xf32>
    %53 = vector.broadcast %52 : vector<1x16x16xf32> to vector<4x16x16xf32>
    %54 = arith.mulf %51, %53 : vector<4x16x16xf32>
    %55 = arith.addf %50, %54 : vector<4x16x16xf32>
    %c0_22 = arith.constant 0 : index
    %c0_23 = arith.constant 0 : index
    %c0_24 = arith.constant 0 : index
    %56 = vector.load %arg12[%c0_22, %c0_23, %c0_24] : memref<4x16x16xf32, #tpu.memory_space<vmem>>, vector<4x16x16xf32>
    tpu.vector_store %arg12[%c0_22, %c0_23, %c0_24], %55 {strides = array<i32>} : memref<4x16x16xf32, #tpu.memory_space<vmem>>, vector<4x16x16xf32>,
    %c0_25 = arith.constant 0 : index
    %c0_26 = arith.constant 0 : index
    %c0_27 = arith.constant 0 : index
    %57 = vector.load %arg13[%c0_25, %c0_26, %c0_27] : memref<4x16x16xf32, #tpu.memory_space<vmem>>, vector<4x16x16xf32>
    tpu.vector_store %arg13[%c0_25, %c0_26, %c0_27], %36 {strides = array<i32>} : memref<4x16x16xf32, #tpu.memory_space<vmem>>, vector<4x16x16xf32>,
    %58 = tpu.iota {dimensions = array<i32: 0>} : vector<16x16xi32>
    %59 = tpu.iota {dimensions = array<i32: 1>} : vector<16x16xi32>
    %60 = arith.cmpi sle, %59, %58 : vector<16x16xi32>
    %cst_28 = arith.constant 0.000000e+00 : f32
    %cst_29 = arith.constant -1.000000e+30 : f32
    %61 = vector.broadcast %cst_28 : f32 to vector<16x16xf32>
    %62 = vector.broadcast %cst_29 : f32 to vector<16x16xf32>
    %63 = arith.select %60, %61, %62 : vector<16x16xi1>, vector<16x16xf32>
    %c0_i32 = arith.constant 0 : i32
    %c1_i32 = arith.constant 1 : i32
    %64 = arith.muli %c0_i32, %c1_i32 : i32
    %c0_i32_30 = arith.constant 0 : i32
    %65 = arith.addi %c0_i32_30, %64 : i32
    %c16_i32 = arith.constant 16 : i32
    %66 = arith.muli %65, %c16_i32 : i32
    %67 = tpu.assume_multiple %66, 16 : i32
    %c0_31 = arith.constant 0 : index
    %68 = arith.index_cast %67 : i32 to index
    %c0_32 = arith.constant 0 : index
    %69 = vector.load %arg11[%c0_31, %68, %c0_32] : memref<4x16x16xf32, #tpu.memory_space<vmem>>, vector<4x16x16xf32>
    %cst_33 = arith.constant -1.000000e+30 : f32
    %70 = vector.broadcast %cst_33 : f32 to vector<4x16x1xf32>
    %cst_34 = arith.constant 0.000000e+00 : f32
    %71 = vector.broadcast %cst_34 : f32 to vector<4x16x1xf32>
    %cst_35 = arith.constant 0.000000e+00 : f32
    %72 = vector.broadcast %cst_35 : f32 to vector<4x16x16xf32>
    %c0_i32_36 = arith.constant 0 : i32
    %73 = arith.subi %65, %c0_i32_36 : i32
    %74 = arith.addi %c0_i32_36, %73 : i32
    %c1_i32_37 = arith.constant 1 : i32
    %75:3 = scf.for %arg15 = %c0_i32_36 to %74 step %c1_i32_37 iter_args(%arg16 = %70, %arg17 = %71, %arg18 = %72) -> (vector<4x16x1xf32>, vector<4x16x1xf32>, vector<4x16x16xf32>)  : i32 {
      %c16_i32_67 = arith.constant 16 : i32
      %142 = arith.muli %arg15, %c16_i32_67 : i32
      %143 = tpu.assume_multiple %142, 16 : i32
      %c0_68 = arith.constant 0 : index
      %144 = arith.index_cast %143 : i32 to index
      %c0_69 = arith.constant 0 : index
      %145 = vector.load %arg12[%c0_68, %144, %c0_69] : memref<4x16x16xf32, #tpu.memory_space<vmem>>, vector<4x16x16xf32>
      %c0_70 = arith.constant 0 : index
      %146 = arith.index_cast %143 : i32 to index
      %c0_71 = arith.constant 0 : index
      %147 = vector.load %arg13[%c0_70, %146, %c0_71] : memref<4x16x16xf32, #tpu.memory_space<vmem>>, vector<4x16x16xf32>
      "tpu.trace_start"() <{level = 10 : i32, message = "hqd,hkd->hqk"}> : () -> ()
      %cst_72 = arith.constant dense<0.000000e+00> : vector<4x16x16xf32>
      %148 = tpu.matmul %69, %145, %cst_72 {dimension_numbers = #tpu.dot_dimension_numbers<[2], [2], [1], [1], [0, 0, 0, 1, 1, 1], [0], [0]>} : vector<4x16x16xf32>, vector<4x16x16xf32>, vector<4x16x16xf32> -> vector<4x16x16xf32>
      "tpu.trace_stop"() : () -> ()
      %cst_73 = arith.constant dense<0xFF800000> : vector<4x16xf32>
      %149 = vector.multi_reduction <maximumf>, %148, %cst_73 [2] : vector<4x16x16xf32> to vector<4x16xf32>
      %150 = vector.shape_cast %149 : vector<4x16xf32> to vector<4x16x1xf32>
      %151 = arith.maximumf %arg16, %150 : vector<4x16x1xf32>
      %152 = arith.subf %arg16, %151 : vector<4x16x1xf32>
      %153 = math.exp %152 : vector<4x16x1xf32>
      %154 = vector.broadcast %151 : vector<4x16x1xf32> to vector<4x16x16xf32>
      %155 = arith.subf %148, %154 : vector<4x16x16xf32>
      %156 = math.exp %155 : vector<4x16x16xf32>
      %157 = arith.mulf %153, %arg17 : vector<4x16x1xf32>
      %cst_74 = arith.constant dense<0.000000e+00> : vector<4x16xf32>
      %158 = vector.multi_reduction <add>, %156, %cst_74 [2] : vector<4x16x16xf32> to vector<4x16xf32>
      %159 = vector.shape_cast %158 : vector<4x16xf32> to vector<4x16x1xf32>
      %160 = arith.addf %157, %159 : vector<4x16x1xf32>
      %161 = vector.broadcast %153 : vector<4x16x1xf32> to vector<4x16x16xf32>
      %162 = arith.mulf %161, %arg18 : vector<4x16x16xf32>
      "tpu.trace_start"() <{level = 10 : i32, message = "hqk,hkd->hqd"}> : () -> ()
      %cst_75 = arith.constant dense<0.000000e+00> : vector<4x16x16xf32>
      %163 = tpu.matmul %156, %147, %cst_75 {dimension_numbers = #tpu.dot_dimension_numbers<[2], [1], [1], [2], [0, 0, 0, 1, 1, 2], [0], [0]>} : vector<4x16x16xf32>, vector<4x16x16xf32>, vector<4x16x16xf32> -> vector<4x16x16xf32>
      "tpu.trace_stop"() : () -> ()
      %164 = arith.addf %162, %163 : vector<4x16x16xf32>
      scf.yield %151, %160, %164 : vector<4x16x1xf32>, vector<4x16x1xf32>, vector<4x16x16xf32>
    }
    %c16_i32_38 = arith.constant 16 : i32
    %76 = arith.muli %65, %c16_i32_38 : i32
    %77 = tpu.assume_multiple %76, 16 : i32
    %c0_39 = arith.constant 0 : index
    %78 = arith.index_cast %77 : i32 to index
    %c0_40 = arith.constant 0 : index
    %79 = vector.load %arg12[%c0_39, %78, %c0_40] : memref<4x16x16xf32, #tpu.memory_space<vmem>>, vector<4x16x16xf32>
    %c0_41 = arith.constant 0 : index
    %80 = arith.index_cast %77 : i32 to index
    %c0_42 = arith.constant 0 : index
    %81 = vector.load %arg13[%c0_41, %80, %c0_42] : memref<4x16x16xf32, #tpu.memory_space<vmem>>, vector<4x16x16xf32>
    "tpu.trace_start"() <{level = 10 : i32, message = "hqd,hkd->hqk"}> : () -> ()
    %cst_43 = arith.constant dense<0.000000e+00> : vector<4x16x16xf32>
    %82 = tpu.matmul %69, %79, %cst_43 {dimension_numbers = #tpu.dot_dimension_numbers<[2], [2], [1], [1], [0, 0, 0, 1, 1, 1], [0], [0]>} : vector<4x16x16xf32>, vector<4x16x16xf32>, vector<4x16x16xf32> -> vector<4x16x16xf32>
    "tpu.trace_stop"() : () -> ()
    %83 = vector.shape_cast %63 : vector<16x16xf32> to vector<1x16x16xf32>
    %84 = vector.broadcast %83 : vector<1x16x16xf32> to vector<4x16x16xf32>
    %85 = arith.addf %82, %84 : vector<4x16x16xf32>
    %cst_44 = arith.constant dense<0xFF800000> : vector<4x16xf32>
    %86 = vector.multi_reduction <maximumf>, %85, %cst_44 [2] : vector<4x16x16xf32> to vector<4x16xf32>
    %87 = vector.shape_cast %86 : vector<4x16xf32> to vector<4x16x1xf32>
    %88 = arith.maximumf %75#0, %87 : vector<4x16x1xf32>
    %89 = arith.subf %75#0, %88 : vector<4x16x1xf32>
    %90 = math.exp %89 : vector<4x16x1xf32>
    %91 = vector.broadcast %88 : vector<4x16x1xf32> to vector<4x16x16xf32>
    %92 = arith.subf %85, %91 : vector<4x16x16xf32>
    %93 = math.exp %92 : vector<4x16x16xf32>
    %94 = arith.mulf %90, %75#1 : vector<4x16x1xf32>
    %cst_45 = arith.constant dense<0.000000e+00> : vector<4x16xf32>
    %95 = vector.multi_reduction <add>, %93, %cst_45 [2] : vector<4x16x16xf32> to vector<4x16xf32>
    %96 = vector.shape_cast %95 : vector<4x16xf32> to vector<4x16x1xf32>
    %97 = arith.addf %94, %96 : vector<4x16x1xf32>
    %98 = vector.broadcast %90 : vector<4x16x1xf32> to vector<4x16x16xf32>
    %99 = arith.mulf %98, %75#2 : vector<4x16x16xf32>
    "tpu.trace_start"() <{level = 10 : i32, message = "hqk,hkd->hqd"}> : () -> ()
    %cst_46 = arith.constant dense<0.000000e+00> : vector<4x16x16xf32>
    %100 = tpu.matmul %93, %81, %cst_46 {dimension_numbers = #tpu.dot_dimension_numbers<[2], [1], [1], [2], [0, 0, 0, 1, 1, 2], [0], [0]>} : vector<4x16x16xf32>, vector<4x16x16xf32>, vector<4x16x16xf32> -> vector<4x16x16xf32>
    "tpu.trace_stop"() : () -> ()
    %101 = arith.addf %99, %100 : vector<4x16x16xf32>
    %102 = tpu.reciprocal %97 : vector<4x16x1xf32> -> vector<4x16x1xf32>
    %103 = vector.broadcast %102 : vector<4x16x1xf32> to vector<4x16x16xf32>
    %104 = arith.mulf %101, %103 : vector<4x16x16xf32>
    %105 = tpu.transpose %104, [1, 0, 2] : vector<4x16x16xf32> -> vector<16x4x16xf32>
    %106 = vector.shape_cast %105 : vector<16x4x16xf32> to vector<16x64xf32>
    %107 = arith.index_cast %67 : i32 to index
    %c0_47 = arith.constant 0 : index
    %108 = vector.load %arg14[%107, %c0_47] : memref<16x64xf32, #tpu.memory_space<vmem>>, vector<16x64xf32>
    tpu.vector_store %arg14[%107, %c0_47], %106 {strides = array<i32>} : memref<16x64xf32, #tpu.memory_space<vmem>>, vector<16x64xf32>,
    %c1_i32_48 = arith.constant 1 : i32
    %c0_49 = arith.constant 0 : index
    %c0_50 = arith.constant 0 : index
    %109 = vector.load %arg14[%c0_49, %c0_50] : memref<16x64xf32, #tpu.memory_space<vmem>>, vector<16x64xf32>
    %c0_51 = arith.constant 0 : index
    %c0_52 = arith.constant 0 : index
    %110 = vector.load %arg3[%c0_51, %c0_52] : memref<64x64xf32, #tpu.memory_space<vmem>>, vector<64x64xf32>
    %cst_53 = arith.constant dense<0.000000e+00> : vector<16x64xf32>
    %111 = tpu.matmul %109, %110, %cst_53 {dimension_numbers = #tpu.dot_dimension_numbers<[1], [0], [0], [1], [0, 0, 1, 1], [], []>} : vector<16x64xf32>, vector<64x64xf32>, vector<16x64xf32> -> vector<16x64xf32>
    %112 = arith.addf %1, %111 : vector<16x64xf32>
    %113 = arith.mulf %112, %112 : vector<16x64xf32>
    %cst_54 = arith.constant dense<0.000000e+00> : vector<16xf32>
    %114 = vector.multi_reduction <add>, %113, %cst_54 [1] : vector<16x64xf32> to vector<16xf32>
    %115 = vector.shape_cast %114 : vector<16xf32> to vector<16x1xf32>
    %cst_55 = arith.constant 6.400000e+01 : f32
    %116 = vector.broadcast %cst_55 : f32 to vector<16x1xf32>
    %117 = arith.divf %115, %116 : vector<16x1xf32>
    %cst_56 = arith.constant 9.99999974E-6 : f32
    %118 = vector.broadcast %cst_56 : f32 to vector<16x1xf32>
    %119 = arith.addf %117, %118 : vector<16x1xf32>
    %120 = math.rsqrt %119 : vector<16x1xf32>
    %121 = vector.broadcast %120 : vector<16x1xf32> to vector<16x64xf32>
    %122 = arith.mulf %112, %121 : vector<16x64xf32>
    %123 = vector.broadcast %3 : vector<1x64xf32> to vector<16x64xf32>
    %124 = arith.mulf %122, %123 : vector<16x64xf32>
    %c0_57 = arith.constant 0 : index
    %c0_58 = arith.constant 0 : index
    %125 = vector.load %arg4[%c0_57, %c0_58] : memref<64x256xf32, #tpu.memory_space<vmem>>, vector<64x256xf32>
    %cst_59 = arith.constant dense<0.000000e+00> : vector<16x256xf32>
    %126 = tpu.matmul %124, %125, %cst_59 {dimension_numbers = #tpu.dot_dimension_numbers<[1], [0], [0], [1], [0, 0, 1, 1], [], []>} : vector<16x64xf32>, vector<64x256xf32>, vector<16x256xf32> -> vector<16x256xf32>
    %127 = vector.extract_strided_slice %126 {offsets = [0, 0], sizes = [16, 128], strides = [1, 1]} : vector<16x256xf32> to vector<16x128xf32>
    %128 = vector.extract_strided_slice %126 {offsets = [0, 128], sizes = [16, 128], strides = [1, 1]} : vector<16x256xf32> to vector<16x128xf32>
    %129 = arith.negf %127 : vector<16x128xf32>
    %130 = math.exp %129 : vector<16x128xf32>
    %cst_60 = arith.constant 1.000000e+00 : f32
    %131 = vector.broadcast %cst_60 : f32 to vector<16x128xf32>
    %132 = arith.addf %131, %130 : vector<16x128xf32>
    %133 = arith.divf %131, %132 : vector<16x128xf32>
    %134 = arith.mulf %127, %133 : vector<16x128xf32>
    %135 = arith.mulf %134, %128 : vector<16x128xf32>
    %c0_61 = arith.constant 0 : index
    %c0_62 = arith.constant 0 : index
    %136 = vector.load %arg5[%c0_61, %c0_62] : memref<128x64xf32, #tpu.memory_space<vmem>>, vector<128x64xf32>
    %cst_63 = arith.constant dense<0.000000e+00> : vector<16x64xf32>
    %137 = tpu.matmul %135, %136, %cst_63 {dimension_numbers = #tpu.dot_dimension_numbers<[1], [0], [0], [1], [0, 0, 1, 1], [], []>} : vector<16x128xf32>, vector<128x64xf32>, vector<16x64xf32> -> vector<16x64xf32>
    %138 = arith.addf %112, %137 : vector<16x64xf32>
    %c0_64 = arith.constant 0 : index
    %c0_65 = arith.constant 0 : index
    %c0_66 = arith.constant 0 : index
    %139 = vector.load %arg10[%c0_64, %c0_65, %c0_66] : memref<1x16x64xf32, #tpu.memory_space<vmem>>, vector<1x16x64xf32>
    %140 = vector.shape_cast %139 : vector<1x16x64xf32> to vector<16x64xf32>
    %141 = vector.shape_cast %138 : vector<16x64xf32> to vector<1x16x64xf32>
    tpu.vector_store %arg10[%c0_64, %c0_65, %c0_66], %141 {strides = array<i32>} : memref<1x16x64xf32, #tpu.memory_space<vmem>>, vector<1x16x64xf32>,
    return
  }
  func.func @transform_0(%arg0: i32) -> (i32, i32, i32) {
    %c0_i32 = arith.constant 0 : i32
    %c0_i32_0 = arith.constant 0 : i32
    %c0_i32_1 = arith.constant 0 : i32
    return %arg0, %c0_i32, %c0_i32_0 : i32, i32, i32
  }
  func.func @transform_1(%arg0: i32) -> (i32, i32) {
    %c0_i32 = arith.constant 0 : i32
    %c0_i32_0 = arith.constant 0 : i32
    %c0_i32_1 = arith.constant 0 : i32
    return %c0_i32, %c0_i32_0 : i32, i32
  }
  func.func @transform_2(%arg0: i32) -> (i32, i32) {
    %c0_i32 = arith.constant 0 : i32
    %c0_i32_0 = arith.constant 0 : i32
    %c0_i32_1 = arith.constant 0 : i32
    return %c0_i32, %c0_i32_0 : i32, i32
  }
  func.func @transform_3(%arg0: i32) -> (i32, i32) {
    %c0_i32 = arith.constant 0 : i32
    %c0_i32_0 = arith.constant 0 : i32
    %c0_i32_1 = arith.constant 0 : i32
    return %c0_i32, %c0_i32_0 : i32, i32
  }
  func.func @transform_4(%arg0: i32) -> (i32, i32) {
    %c0_i32 = arith.constant 0 : i32
    %c0_i32_0 = arith.constant 0 : i32
    %c0_i32_1 = arith.constant 0 : i32
    return %c0_i32, %c0_i32_0 : i32, i32
  }
  func.func @transform_5(%arg0: i32) -> (i32, i32) {
    %c0_i32 = arith.constant 0 : i32
    %c0_i32_0 = arith.constant 0 : i32
    %c0_i32_1 = arith.constant 0 : i32
    return %c0_i32, %c0_i32_0 : i32, i32
  }
  func.func @transform_6(%arg0: i32) -> (i32, i32) {
    %c0_i32 = arith.constant 0 : i32
    %c0_i32_0 = arith.constant 0 : i32
    %c0_i32_1 = arith.constant 0 : i32
    return %c0_i32, %c0_i32_0 : i32, i32
  }
  func.func @transform_7(%arg0: i32) -> (i32, i32) {
    %c0_i32 = arith.constant 0 : i32
    %c0_i32_0 = arith.constant 0 : i32
    %c0_i32_1 = arith.constant 0 : i32
    return %c0_i32, %c0_i32_0 : i32, i32
  }
  func.func @transform_8(%arg0: i32) -> (i32, i32) {
    %c0_i32 = arith.constant 0 : i32
    %c0_i32_0 = arith.constant 0 : i32
    %c0_i32_1 = arith.constant 0 : i32
    return %c0_i32, %c0_i32_0 : i32, i32
  }
  func.func @transform_9(%arg0: i32) -> (i32, i32, i32) {
    %c0_i32 = arith.constant 0 : i32
    %c0_i32_0 = arith.constant 0 : i32
    %c0_i32_1 = arith.constant 0 : i32
    return %arg0, %c0_i32, %c0_i32_0 : i32, i32, i32
  }
}

</mosaic_0001>

<bundles_post_ra>
// kernel: tpu_custom_call.1
= control target key start
LH: loop header
LB: loop body
LE: loop exit
PB: predicated region body
PF: predicated region fallthrough
CT: control target
= control target key end

     0   :  { %s4827_s0 = inlined_call_operand.hbm [shape: f32[2,16,64], index: 0, kind: input, shape index: {}]   ;;  %s4828_s1 = inlined_call_operand.vmem [shape: f32[64,192], index: 1, kind: input, shape index: {}]   ;;  %s4829_s2 = inlined_call_operand.vmem [shape: f32[64,64], index: 2, kind: input, shape index: {}]   ;;  %s4830_s3 = inlined_call_operand.hbm [shape: f32[64,256], index: 3, kind: input, shape index: {}]   ;;  %s4831_s4 = inlined_call_operand.vmem [shape: f32[128,64], index: 4, kind: input, shape index: {}]   ;;  %s4832_s5 = inlined_call_operand.vmem [shape: f32[1,64], index: 5, kind: input, shape index: {}]   ;;  %s4833_s6 = inlined_call_operand.vmem [shape: f32[1,64], index: 6, kind: input, shape index: {}]   ;;  %s4834_s7 = inlined_call_operand.hbm [shape: f32[16,16], index: 7, kind: input, shape index: {}]   ;;  %s4835_s8 = inlined_call_operand.hbm [shape: f32[16,16], index: 8, kind: input, shape index: {}]   ;;  %s4836_s9 = inlined_call_operand.hbm [shape: f32[2,16,64], index: 9, kind: output, shape index: {}]  }
   0x1   :  { %4843 = sst [smem:[#allocation19_spill]] %s4830_s3 }
   0x2   :  { %4844 = sst [smem:[#allocation20_spill]] %s4834_s7 }
   0x3   :  { %4845 = sst [smem:[#allocation21_spill]] %s4835_s8 }
   0x4   :  { %14 = vsyncpa [#allocation7], 0 }
   0x5   :  { %16 = vsyncpa [#allocation7 + $0x1], 0 }
   0x6   :  { %17 = vsyncpa [#allocation10], 0 }
   0x7   :  { %18 = vsyncpa [#allocation13], 0 }
   0x8   :  { %19 = vsyncpa [#allocation8], 0 }
   0x9   :  { %21 = vsyncpa [#allocation8 + $0x1], 0  ;;  %s3919_s30 = smov 0   ;;  %s3921_s10 = smov 0  }
   0xa   :  { %s3923_s11 = smov 0   ;;  %s3925_s12 = smov 0  }
   0xb LB: > { %s3940_s13 = sadd.s32 4294967295, %s3844_s12   ;;  %s3263_s14 = sadd.s32 4294967294, %s3844_s12   ;;  %s3844_s12 = sphi %s3925_s12, %s4870_s12   ;;  %s3840_s11 = sphi %s3923_s11, %s4869_s11   ;;  %s3836_s10 = sphi %s3921_s10, %s4868_s10   ;;  %s3832_s30 = sphi %s3919_s30, %s4867_s30  }
   0xc   : > { %p47_p0 = scmp.ne.s32.totalorder %s3836_s10, %s3832_s30  ;;  %p4837_p1 = scmp.eq.s32.totalorder %s3940_s13, 0 }
   0xd   : > { %p245_p3 = scmp.eq.s32.totalorder %s3263_s14, 1  ;;  %p3264_p5 = scmp.ge.s32.totalorder %s3844_s12, 1 }
   0xe   : > { %p3949_p4 = por %p4837_p1, %p47_p0  ;;  %p252_p7 = scmp.lt.s32.totalorder %s3844_s12, 3 }
   0xf   : > { %p3954_p6 = por %p245_p3, %p47_p0  ;;  %s3846_s18 = smov [#allocation9]  }
  0x10   : > { %s4846_s15 = scalar_select %p3949_p4, 1, 0 }
  0x11   : > { %s4847_s16 = scalar_select %p3954_p6, 1, 0 }
  0x12   : > { %p3959_p8 = pnand %p3264_p5, %p252_p7  ;;  %s270_s19 = sshll.u32 %s3846_s18, 4  ;;  %s271_s19 = int_to_ptr.vmem [resolvable:$true] %s270_s19 }
  0x13   : > { %s3847_s21 = smov [#allocation11]   ;;  %s3677_s23 = scalar_lea.vmem %s271_s19, 2048 }
  0x14   : > { %s4848_s17 = scalar_select %p3959_p8, 1, 0 }
  0x15   : > { %p3521_p9 = pneg %p3959_p8  ;;  %s292_s22 = sshll.u32 %s3847_s21, 4  ;;  %s293_s22 = int_to_ptr.vmem [resolvable:$true] %s292_s22 }
  0x16   : > { %p3678_p13 = scmp.ne.s32.totalorder %s271_s19, %s3677_s23  ;;  %p3685_p5 = scmp.lt.s32.totalorder %s271_s19, %s271_s19 }
  0x17   : > { %p3968_p11 = pnand %p3521_p9, %p4837_p1  ;;  %p3686_p7 = scmp.lt.s32.totalorder %s3677_s23, %s3677_s23 }
  0x19   : > { %p3668_p12 = pneg %p3968_p11  ;;  %p3687_p10 = por %p3686_p7, %p3685_p5 }
  0x1b   : > { %p3680_p0 = pnand %p3678_p13, %p3668_p12 }
  0x1d   : > { %p3681_p3 = pneg %p3680_p0 }
  0x1f   : > { %p3688_p9 = pnand %p3687_p10, %p3681_p3 }
  0x21   : > { %3691 = shalt.err (!%p3688_p9)
}
  0x22   : > { %s3848_s24 = smov 256   ;;  %s3849_s25 = smov 16  }
  0x23   : > { %s4850_s3 = sld [smem:[#allocation19_spill]]  ;;  %s3703_s28 = scalar_lea.vmem %s293_s22, 256 }
  0x24   : > { %p3704_p1 = scmp.ne.s32.totalorder %s293_s22, %s3703_s28  ;;  %p3711_p2 = scmp.lt.s32.totalorder %s293_s22, %s293_s22 }
  0x25   : > { %p3712_p6 = scmp.lt.s32.totalorder %s3703_s28, %s3703_s28 }
  0x26   : > { %p3706_p13 = pnand %p3704_p1, %p3668_p12 }
  0x27   : > { %p3713_p5 = por %p3712_p6, %p3711_p2 }
  0x28   : > { %p3707_p0 = pneg %p3706_p13 }
  0x29   : > { %3524 = dma.hbm_to_vmem [thread:$0]  (!%p3968_p11), %s4850_s3, 2048, %s271_s19, [#allocation10], %s3848_s24, %s3848_s24, %s3849_s25  }
  0x2a   : > { %p3714_p10 = pnand %p3713_p5, %p3707_p0 }
  0x2c   : > { %3717 = shalt.err (!%p3714_p10)
}
  0x2d   : > { %s4838_s29 = smov 128   ;;  %s4839_s14 = smov 8  }
  0x2e   : > { %s4851_s7 = sld [smem:[#allocation20_spill]]  ;;  %s3852_s21 = smov [#allocation12]  }
  0x2f   : > { %s305_s23 = sshll.u32 %s3852_s21, 4  ;;  %s3994_s24 = sadd.s32 1, %s3844_s12   ;;  %s306_s23 = int_to_ptr.vmem [resolvable:$true] %s305_s23 }
  0x30   : > { %s3729_s25 = scalar_lea.vmem %s306_s23, 256  ;;  %p3737_p3 = scmp.lt.s32.totalorder %s306_s23, %s306_s23 }
  0x31   : > { %p3730_p1 = scmp.ne.s32.totalorder %s306_s23, %s3729_s25  ;;  %p3738_p7 = scmp.lt.s32.totalorder %s3729_s25, %s3729_s25 }
  0x33   : > { %p3732_p2 = pnand %p3730_p1, %p3668_p12  ;;  %p3739_p9 = por %p3738_p7, %p3737_p3 }
  0x34   : > { %3527 = dma.hbm_to_vmem [thread:$0]  (!%p3968_p11), %s4851_s7, 256, %s293_s22, [#allocation10], %s4838_s29, %s4838_s29, %s4839_s14  }
  0x35   : > { %p3733_p6 = pneg %p3732_p2 }
  0x37   : > { %p3740_p13 = pnand %p3739_p9, %p3733_p6 }
  0x39   : > { %3743 = shalt.err (!%p3740_p13)
}
  0x3a   : > { %s4852_s8 = sld [smem:[#allocation21_spill]]  ;;  %s31_s27 = ssub.s32 %s3844_s12, %s3994_s24 }
  0x3b   : > { %s34_s20 = sadd.s32 1, %s3840_s11  ;;  %p32_p12 = scmp.eq.s32.totalorder %s31_s27, 0 }
  0x3c   : > { %p41_p0 = scmp.ne.s32.totalorder %s3840_s11, %s3836_s10  ;;  %p42_p5 = scmp.eq.s32.totalorder %s3844_s12, 0 }
  0x3d   : > { %p3542_p10 = scmp.lt.s32.totalorder %s3844_s12, 2  ;;  %p4853_p2 = scmp.eq.s32.totalorder %s3940_s13, 1 }
  0x3e   : > { %s4015_s28 = scalar_select %p32_p12, %s3840_s11, %s34_s20  }
  0x3f   : > { %p43_p1 = por %p42_p5, %p41_p0  ;;  %p4019_p6 = por %p4853_p2, %p41_p0 }
  0x40   : > { %3530 = dma.hbm_to_vmem [thread:$0]  (!%p3968_p11), %s4852_s8, 256, %s306_s23, [#allocation13], %s4838_s29, %s4838_s29, %s4839_s14  }
  0x41   : > { %s4854_s18 = scalar_select %p4019_p6, 1, 0 }
  0x42   : > { %s319_s19 = sand.u32 1, %s3840_s11   ;;  %s3333_s21 = sshll.u32 %s3844_s12, 8 }
  0x43   : > { %s3269_s25 = sshll.u32 %s319_s19, 4  ;;  %s4028_s23 = scalar_lea.hbm %s4827_s0, %s3333_s21 }
  0x44   : > { %s323_s27 = scalar_lea.vmem [#allocation6], %s3269_s25  ;;  %p4030_p11 = pnand %p3542_p10, %p43_p1 }
  0x45   : > { %s330_s20 = sshll.u32 %s323_s27, 4  ;;  %s4036_s14 = scalar_lea.sflag [#allocation7], %s319_s19  ;;  %s4034_s20 = int_to_ptr.vmem [resolvable:$true] %s330_s20 }
  0x46   : > { %s3744_s3 = scalar_lea.hbm %s4028_s23, 256  ;;  %p3746_p7 = pneg %p4030_p11 }
  0x47   : > { %p3745_p3 = scmp.ne.s32.totalorder %s4028_s23, %s3744_s3  ;;  %s3749_s25 = scalar_lea.hbm %s4827_s0, 512 }
  0x48   : > { %p3750_p12 = scmp.lt.s32.totalorder %s4028_s23, %s4827_s0  ;;  %p3751_p0 = scmp.lt.s32.totalorder %s3749_s25, %s3744_s3 }
  0x49   : > { %p3747_p9 = pnand %p3746_p7, %p3745_p3 }
  0x4a   : > { %p3752_p5 = por %p3751_p0, %p3750_p12 }
  0x4b   : > { %p3748_p13 = pneg %p3747_p9 }
  0x4d   : > { %p3753_p10 = pnand %p3752_p5, %p3748_p13 }
  0x4f   : > { %3756 = shalt.err (!%p3753_p10)
}
  0x50   : > { %s3757_s19 = scalar_lea.vmem %s4034_s20, 256  ;;  %s3853_s7 = smov [#allocation6]  }
  0x51   : > { %p3758_p1 = scmp.ne.s32.totalorder %s4034_s20, %s3757_s19  ;;  %s3762_s8 = sshll.u32 %s3853_s7, 4  ;;  %s3763_s8 = int_to_ptr.vmem [resolvable:$false] %s3762_s8 }
  0x52   : > { %s3764_s21 = scalar_lea.vmem %s3763_s8, 512  ;;  %p3765_p9 = scmp.lt.s32.totalorder %s4034_s20, %s3763_s8 }
  0x53   : > { %p3760_p2 = pnand %p3758_p1, %p3746_p7  ;;  %p3766_p6 = scmp.lt.s32.totalorder %s3764_s21, %s3757_s19 }
  0x55   : > { %p3761_p3 = pneg %p3760_p2  ;;  %p3767_p4 = por %p3766_p6, %p3765_p9 }
  0x57   : > { %p3768_p8 = pnand %p3767_p4, %p3761_p3 }
  0x59   : > { %3771 = shalt.err (!%p3768_p8)
}
  0x5a   : > { %s4856_s3 = smov 8   ;;  %s4857_s22 = smov 128  }
  0x5b   : > { %3534 = dma.hbm_to_vmem [thread:$0]  (!%p4030_p11), %s4028_s23, 256, %s4034_s20, %s4036_s14, %s4857_s22, %s4857_s22, %s4856_s3  }
  0x5c   : > { %p4858_p7 = scmp.ne.s32.totalorder %s4848_s17, 0 }
  0x5d   : > { %s4063_s7 = sand.u32 (!%p4858_p7), 1, %s3836_s10   ;;  %p4859_p4 = scmp.ne.s32.totalorder (!%p4858_p7), %s4846_s15, 0 }
  0x5e   : > { %342 = sbr.rel (%p4858_p7) target bundleno = 2687 (0xa7f), region = 56  ;;  %s3273_s8 = sshll.u32 (!%p4858_p7), %s4063_s7, 4 }
  0x5f   : > { %s345_s25 = scalar_lea.sflag (!%p4858_p7), [#allocation7], %s4063_s7  ;;  %s4069_s29 = scalar_lea.vmem (!%p4858_p7), [#allocation6], %s3273_s8 }
  0x63   : > { %3815 = dma.done.wait (%p4859_p4), %s345_s25, 256  }
  0x64   : > { %3817 = vsyncadd (%p4859_p4), %s345_s25, 4294967040  ;;  %p4860_p8 = scmp.eq.s32.totalorder %s3940_s13, 0 }
  0x66   : > { %3819 = dma.done.wait (%p4860_p8), [#allocation10], 2304   ;;  %p4861_p6 = pmov %p4860_p8 }
  0x68   : > { %3821 = vsyncadd (%p4861_p6), [#allocation10], 4294964992  ;;  %p4862_p11 = pmov %p4861_p6 }
  0x69   : > { %p4863_p13 = pmov %p4861_p6 }
  0x6a   : > { %3823 = dma.done.wait (%p4862_p11), [#allocation13], 256  }
  0x6b   : > { %3825 = vsyncadd (%p4863_p13), [#allocation13], 4294967040  ;;  %v395_v0 = vld [vmem:[%s4069_s29] sm:$0xff]  ;;  %vm414_vm0 = vcmask 523264   ;;  %v396_v1 = vld [vmem:[%s4069_s29 + $0x8] sm:$0xff]  ;;  %v3854_v13 = vmov 0.0   ;;  %v403_v39 = vlaneseq }
  0x6c   : > { %v412_v2 = vmul.f32 %v395_v0, %v395_v0  ;;  %v413_v3 = vmul.f32 %v396_v1, %v396_v1  ;;  %v453_v6 = vld [vmem:[%s4828_s1 + $0x78] sm:$0xff]  ;;  %v452_v7 = vld [vmem:[%s4828_s1 + $0x70] sm:$0xff]  ;;  %v451_v8 = vld [vmem:[%s4828_s1 + $0x68] sm:$0xff]  ;;  %524 = vmatprep.mubr.f32.mxu1 %v3854_v13  ;;  %s3855_s22 = smov 80   ;;  %s3856_s25 = smov 112   ;;  %vm1425_vm1 = vcmask 1047680  }
  0x6d   : > { %476 = vmatprep.subr.mxu1 %v453_v6  ;;  %v450_v9 = vld [vmem:[%s4828_s1 + $0x60] sm:$0xff]  ;;  %v449_v10 = vld [vmem:[%s4828_s1 + $0x58] sm:$0xff]  ;;  %v448_v11 = vld [vmem:[%s4828_s1 + $0x50] sm:$0xff]  ;;  %s3857_s15 = smov 96   ;;  %s3858_s17 = smov 64   ;;  %v4159_v45 = vshrl.u32 %v403_v39, 7 }
  0x6e   : > { %v415_v4 = vsel %vm414_vm0, %v412_v2, 0.0  ;;  %v418_v5 = vsel %vm414_vm0, %v413_v3, 0.0  ;;  %477 = vmatpush1.msra.mxu1 %v452_v7  ;;  %v447_v12 = vld [vmem:[%s4828_s1 + $0x48] sm:$0xff]  ;;  %v446_v14 = vld [vmem:[%s4828_s1 + $0x40] sm:$0xff]  ;;  %v445_v15 = vld [vmem:[%s4828_s1 + $0x38] sm:$0xff]  ;;  %s3861_s14 = smov 16  }
  0x6f   : > { %416 = vadd.xlane.f32.xlu0 %v415_v4  ;;  %478 = vmatprep.subr.mxu1 %v451_v8  ;;  %v444_v16 = vld [vmem:[%s4828_s1 + $0x30] sm:$0xff]  ;;  %v443_v17 = vld [vmem:[%s4828_s1 + $0x28] sm:$0xff]  ;;  %v442_v18 = vld [vmem:[%s4828_s1 + $0x20] sm:$0xff]  ;;  %v3859_v40 = vmov 1983009808   ;;  %s3862_s23 = smov 8  }
  0x70   : > { %479 = vmatpush1.msra.mxu1 %v450_v9  ;;  %v441_v19 = vld [vmem:[%s4828_s1 + $0x18] sm:$0xff]  ;;  %v440_v20 = vld [vmem:[%s4828_s1 + $0x10] sm:$0xff]  ;;  %v439_v21 = vld [vmem:[%s4828_s1 + $0x8] sm:$0xff]  ;;  %v560_v41 = vunpack.c.l.s4 %v3859_v40  ;;  %v3860_v42 = vmov 1934713408   ;;  %s3863_s20 = smov 120  }
  0x71   : > { %480 = vmatprep.subr.mxu1 %v449_v10  ;;  %v438_v22 = vld [vmem:[%s4828_s1] sm:$0xff]  ;;  %v592_v43 = vunpack.c.l.s4 %v3860_v42  ;;  %vm1538_vm3 = vcmask 130048   ;;  %s3865_s19 = smov 32   ;;  %vm2812_vm6 = vcmask 261120   ;;  %vm2815_vm7 = vcmask 392192   ;;  %p4864_p0 = scmp.ne.s32.totalorder %s4854_s18, 0 }
  0x72   : > { %481 = vmatpush1.msra.mxu1 %v448_v11  ;;  %v3278_v30 = vld [vmem:[%s4832_s5] ss:$0 sm:$0xff]  ;;  %v561_v44 = vunpack.c.0.s8 %v560_v41  ;;  %s3867_s26 = smov [#allocation14]  }
  0x73   : > { %419 = vadd.xlane.f32.xlu0 %v418_v5  ;;  %482 = vmatprep.subr.mxu1 %v447_v12  ;;  %v593_v48 = vunpack.c.0.s8 %v592_v43  ;;  %s3776_s27 = sshll.u32 %s3867_s26, 4  ;;  %s3777_s27 = int_to_ptr.vmem [resolvable:$false] %s3776_s27 }
  0x74   : > { %483 = vmatpush1.msra.mxu1 %v446_v14  ;;  %v4163_v49 = vsub.s32 %v561_v44, %v4159_v45 }
  0x75   : > { %484 = vmatprep.subr.mxu1 %v445_v15  ;;  %v4167_v55 = vsub.s32 %v593_v48, %v4159_v45 }
  0x76   : > { %485 = vmatpush1.msra.mxu1 %v444_v16 }
  0x77   : > { %486 = vmatprep.subr.mxu1 %v443_v17 }
  0x78   : > { %487 = vmatpush1.msra.mxu1 %v442_v18 }
  0x79   : > { %488 = vmatprep.subr.mxu1 %v441_v19 }
  0x7a   : > { %489 = vmatpush1.msra.mxu1 %v440_v20 }
  0x7b   : > { %490 = vmatprep.subr.mxu1 %v439_v21 }
  0x7c   : > { %491 = vmatpush1.msra.mxu1 %v438_v22 }
  0xf8   : > { %v417_v23 = vpop.xlane.xlu0 %416 }
  0xf9   : > { %v422_v24 = vmul.f32 0.015625, %v417_v23 }
  0xfb   : > { %v424_v25 = vadd.f32 1e-05, %v422_v24 }
  0xfc   : > { %v420_v26 = vpop.xlane.xlu0 %419 }
  0xfd   : > { %3600 = vrsqrt.f32 %v424_v25  ;;  %v423_v27 = vmul.f32 0.015625, %v420_v26 }
  0xff   : > { %v425_v28 = vadd.f32 1e-05, %v423_v27 }
 0x101   : > { %3602 = vrsqrt.f32 %v425_v28 }
 0x10a   : > { %v3601_v29 = vpop.eup %3600 }
 0x10b   : > { %v428_v31 = vmul.f32 %v3601_v29, %v395_v0 }
 0x10d   : > { %v436_v32 = vmul.f32 %v3278_v30, %v428_v31 }
 0x10e   : > { %v3603_v33 = vpop.eup %3602 }
 0x10f   : > { %3279 = vmatmul.mubr.msk.f32.vlgmr.msra.gmra.mxu1 %vm414_vm0, %v436_v32  ;;  %v429_v34 = vmul.f32 %v3603_v33, %v396_v1 }
 0x110   : > { %530 = vmatprep.mubr.f32.mxu1 %v3854_v13 }
 0x111   : > { %v437_v35 = vmul.f32 %v3278_v30, %v429_v34 }
 0x113   : > { %3280 = vmatmul.mubr.msk.f32.gmra.mxu1 %vm414_vm0, %v437_v35 }
 0x1cf   : > { %v4142_v36 = vpop.f32.mrf.mxu1 }
 0x1d1   : > { %v4144_v37 = vpop.f32.mrf.mxu1 }
 0x1d3   : > { %v532_v38 = vpop.f32.mrf.mxu1 }
 0x1d4   : > { %553 = vrot.lane.b32.xlu0 %v532_v38, %s3855_s22  ;;  %541 = vrot.lane.b32.xlu1 %v532_v38, %s3856_s25 }
 0x1d8   : > { %547 = vrot.lane.b32.xlu1 %v532_v38, %s3857_s15 }
 0x1dc   : > { %539 = vrot.lane.b32.xlu1 %v4142_v36, %s3856_s25 }
 0x1e0   : > { %545 = vrot.lane.b32.xlu1 %v4142_v36, %s3857_s15 }
 0x1e4   : > { %551 = vrot.lane.b32.xlu1 %v4142_v36, %s3855_s22 }
 0x1e8   : > { %829 = vrot.lane.b32.xlu1 %v4142_v36, %s3858_s17 }
 0x1ec   : > { %831 = vrot.lane.b32.xlu1 %v532_v38, %s3858_s17 }
 0x246   : > { %v554_v46 = vpop.permute.xlu0 %553  ;;  %v542_v47 = vpop.permute.xlu1 %541 }
 0x247   : > { %835 = vrot.lane.b32.xlu1 %v542_v47, %s3858_s17  ;;  %v641_v50 = vcombine.low %v542_v47, %v554_v46  ;;  %v642_v51 = vcombine.high %v542_v47, %v554_v46 }
 0x249   : > { %v649_v56 = vrot.slane %v641_v50, %v4163_v49  ;;  %v656_v57 = vrot.slane %v642_v51, %v4163_v49 }
 0x24a   : > { %v548_v52 = vpop.permute.xlu1 %547 }
 0x24b   : > { %v625_v53 = vcombine.low %v532_v38, %v548_v52  ;;  %v626_v54 = vcombine.high %v532_v38, %v548_v52  ;;  %839 = vrot.lane.b32.xlu1 %v548_v52, %s3858_s17 }
 0x24d   : > { %v633_v58 = vrot.slane %v625_v53, %v4163_v49  ;;  %v640_v59 = vrot.slane %v626_v54, %v4163_v49 }
 0x24e   : > { %v540_v60 = vpop.permute.xlu1 %539 }
 0x24f   : > { %v657_v61 = vcombine.low %v633_v58, %v649_v56  ;;  %v658_v62 = vcombine.high %v633_v58, %v649_v56  ;;  %v673_v63 = vcombine.low %v640_v59, %v656_v57  ;;  %v674_v0 = vcombine.high %v640_v59, %v656_v57  ;;  %833 = vrot.lane.b32.xlu0 %v540_v60, %s3858_s17 }
 0x251   : > { %v665_v1 = vrot.slane %v657_v61, %v4167_v55  ;;  %v672_v2 = vrot.slane %v658_v62, %v4167_v55  ;;  %v681_v3 = vrot.slane %v673_v63, %v4167_v55  ;;  %v688_v4 = vrot.slane %v674_v0, %v4167_v55 }
 0x252   : > { %v546_v5 = vpop.permute.xlu1 %545 }
 0x253   : > { %v761_v6 = vcombine.low %v665_v1, %v672_v2  ;;  %v3283_v7 = vcombine.high %v665_v1, %v672_v2  ;;  %v777_v8 = vcombine.low %v681_v3, %v688_v4  ;;  %v3284_v9 = vcombine.high %v681_v3, %v688_v4  ;;  %843 = vrot.lane.b32.xlu0 %v554_v46, %s3858_s17 }
 0x254   : > { %v557_v10 = vcombine.low %v4142_v36, %v546_v5  ;;  %v558_v11 = vcombine.high %v4142_v36, %v546_v5  ;;  %837 = vrot.lane.b32.xlu1 %v546_v5, %s3858_s17 }
 0x255   : > { %v768_v12 = vrot.slane %v761_v6, %v4163_v49  ;;  %v776_v14 = vrot.slane %v3283_v7, %v4163_v49  ;;  %v784_v15 = vrot.slane %v777_v8, %v4163_v49  ;;  %v792_v16 = vrot.slane %v3284_v9, %v4163_v49 }
 0x256   : > { %v552_v17 = vpop.permute.xlu1 %551  ;;  %v565_v22 = vrot.slane %v557_v10, %v4163_v49  ;;  %v572_v23 = vrot.slane %v558_v11, %v4163_v49 }
 0x257   : > { %v573_v18 = vcombine.low %v540_v60, %v552_v17  ;;  %v574_v19 = vcombine.high %v540_v60, %v552_v17  ;;  %841 = vrot.lane.b32.xlu0 %v552_v17, %s3858_s17  ;;  %v793_v20 = vcombine.low %v768_v12, %v776_v14  ;;  %v809_v21 = vcombine.low %v784_v15, %v792_v16 }
 0x258   : > { %v794_v24 = vcombine.high %v768_v12, %v776_v14  ;;  %v810_v25 = vcombine.high %v784_v15, %v792_v16 }
 0x259   : > { %v581_v26 = vrot.slane %v573_v18, %v4163_v49  ;;  %v588_v27 = vrot.slane %v574_v19, %v4163_v49  ;;  %v801_v28 = vrot.slane %v793_v20, %v4167_v55  ;;  %v817_v29 = vrot.slane %v809_v21, %v4167_v55 }
 0x25a   : > { %v808_v30 = vrot.slane %v794_v24, %v4167_v55  ;;  %v824_v31 = vrot.slane %v810_v25, %v4167_v55  ;;  %v830_v5 = vpop.permute.xlu1 %829 }
 0x25b   : > { %v589_v32 = vcombine.low %v565_v22, %v581_v26  ;;  %v590_v33 = vcombine.high %v565_v22, %v581_v26  ;;  %v605_v34 = vcombine.low %v572_v23, %v588_v27  ;;  %v606_v35 = vcombine.high %v572_v23, %v588_v27 }
 0x25c   : > { %v4195_v36 = vcombine.low %v801_v28, %v817_v29  ;;  %v4197_v38 = vcombine.high %v801_v28, %v817_v29  ;;  %v4199_v40 = vcombine.low %v808_v30, %v824_v31  ;;  %v4201_v41 = vcombine.high %v808_v30, %v824_v31 }
 0x25d   : > { %v597_v42 = vrot.slane %v589_v32, %v4167_v55  ;;  %v604_v43 = vrot.slane %v590_v33, %v4167_v55  ;;  %v613_v44 = vrot.slane %v605_v34, %v4167_v55  ;;  %v620_v46 = vrot.slane %v606_v35, %v4167_v55 }
 0x25e   : > { %1429 = vrot.lane.b32.xlu0 %v4195_v36, %s3861_s14  ;;  %v832_v6 = vpop.permute.xlu1 %831 }
 0x25f   : > { %v693_v47 = vcombine.low %v597_v42, %v604_v43  ;;  %v3281_v48 = vcombine.high %v597_v42, %v604_v43  ;;  %v709_v50 = vcombine.low %v613_v44, %v620_v46  ;;  %v3282_v51 = vcombine.high %v613_v44, %v620_v46 }
 0x261   : > { %v700_v52 = vrot.slane %v693_v47, %v4163_v49  ;;  %v708_v53 = vrot.slane %v3281_v48, %v4163_v49  ;;  %v716_v54 = vrot.slane %v709_v50, %v4163_v49  ;;  %v724_v56 = vrot.slane %v3282_v51, %v4163_v49 }
 0x263   : > { %v725_v57 = vcombine.low %v700_v52, %v708_v53  ;;  %v741_v58 = vcombine.low %v716_v54, %v724_v56  ;;  %v726_v59 = vcombine.high %v700_v52, %v708_v53  ;;  %v742_v60 = vcombine.high %v716_v54, %v724_v56 }
 0x265   : > { %v733_v61 = vrot.slane %v725_v57, %v4167_v55  ;;  %v749_v62 = vrot.slane %v741_v58, %v4167_v55  ;;  %v740_v63 = vrot.slane %v726_v59, %v4167_v55  ;;  %v756_v0 = vrot.slane %v742_v60, %v4167_v55 }
 0x267   : > { %v4217_v1 = vcombine.low %v733_v61, %v749_v62  ;;  %v4219_v2 = vcombine.high %v733_v61, %v749_v62  ;;  %v4221_v3 = vcombine.low %v740_v63, %v756_v0  ;;  %v4223_v4 = vcombine.high %v740_v63, %v756_v0 }
 0x269   : > { %1426 = vrot.lane.b32.xlu1 %v4217_v1, %s3861_s14 }
 0x2b9   : > { %v836_v7 = vpop.permute.xlu1 %835 }
 0x2bd   : > { %v840_v8 = vpop.permute.xlu1 %839 }
 0x2be   : > { %v921_v10 = vcombine.low %v832_v6, %v840_v8  ;;  %v922_v11 = vcombine.high %v832_v6, %v840_v8 }
 0x2c0   : > { %v929_v17 = vrot.slane %v921_v10, %v4163_v49  ;;  %v936_v18 = vrot.slane %v922_v11, %v4163_v49 }
 0x2c1   : > { %v834_v9 = vpop.permute.xlu0 %833 }
 0x2c5   : > { %v844_v12 = vpop.permute.xlu0 %843 }
 0x2c6   : > { %v937_v14 = vcombine.low %v836_v7, %v844_v12  ;;  %v938_v15 = vcombine.high %v836_v7, %v844_v12  ;;  %v838_v16 = vpop.permute.xlu1 %837 }
 0x2c7   : > { %v853_v21 = vcombine.low %v830_v5, %v838_v16  ;;  %v854_v22 = vcombine.high %v830_v5, %v838_v16 }
 0x2c8   : > { %v945_v19 = vrot.slane %v937_v14, %v4163_v49  ;;  %v952_v20 = vrot.slane %v938_v15, %v4163_v49 }
 0x2c9   : > { %v842_v23 = vpop.permute.xlu0 %841  ;;  %v861_v34 = vrot.slane %v853_v21, %v4163_v49  ;;  %v868_v35 = vrot.slane %v854_v22, %v4163_v49 }
 0x2ca   : > { %v953_v24 = vcombine.low %v929_v17, %v945_v19  ;;  %v954_v25 = vcombine.high %v929_v17, %v945_v19  ;;  %v969_v26 = vcombine.low %v936_v18, %v952_v20  ;;  %v970_v27 = vcombine.high %v936_v18, %v952_v20 }
 0x2cb   : > { %v869_v28 = vcombine.low %v834_v9, %v842_v23  ;;  %v870_v29 = vcombine.high %v834_v9, %v842_v23 }
 0x2cc   : > { %v961_v30 = vrot.slane %v953_v24, %v4167_v55  ;;  %v968_v31 = vrot.slane %v954_v25, %v4167_v55  ;;  %v977_v32 = vrot.slane %v969_v26, %v4167_v55  ;;  %v984_v33 = vrot.slane %v970_v27, %v4167_v55 }
 0x2cd   : > { %v877_v42 = vrot.slane %v869_v28, %v4163_v49  ;;  %v884_v43 = vrot.slane %v870_v29, %v4163_v49 }
 0x2ce   : > { %v1057_v44 = vcombine.low %v961_v30, %v968_v31  ;;  %v3287_v46 = vcombine.high %v961_v30, %v968_v31  ;;  %v1073_v47 = vcombine.low %v977_v32, %v984_v33  ;;  %v3288_v48 = vcombine.high %v977_v32, %v984_v33 }
 0x2cf   : > { %v885_v50 = vcombine.low %v861_v34, %v877_v42  ;;  %v886_v51 = vcombine.high %v861_v34, %v877_v42  ;;  %v901_v52 = vcombine.low %v868_v35, %v884_v43  ;;  %v902_v53 = vcombine.high %v868_v35, %v884_v43  ;;  %v402_v42 = vld [vmem:[#allocation12 + $0x8] sm:$0xff] }
 0x2d0   : > { %v1064_v54 = vrot.slane %v1057_v44, %v4163_v49  ;;  %v1072_v56 = vrot.slane %v3287_v46, %v4163_v49  ;;  %v1080_v57 = vrot.slane %v1073_v47, %v4163_v49  ;;  %v1088_v58 = vrot.slane %v3288_v48, %v4163_v49  ;;  %v401_v48 = vld [vmem:[#allocation12] sm:$0xff] }
 0x2d1   : > { %v893_v59 = vrot.slane %v885_v50, %v4167_v55  ;;  %v900_v60 = vrot.slane %v886_v51, %v4167_v55  ;;  %v909_v61 = vrot.slane %v901_v52, %v4167_v55  ;;  %v916_v62 = vrot.slane %v902_v53, %v4167_v55  ;;  %v1430_v52 = vpop.permute.xlu0 %1429 }
 0x2d2   : > { %v1089_v63 = vcombine.low %v1064_v54, %v1072_v56  ;;  %v1105_v0 = vcombine.low %v1080_v57, %v1088_v58  ;;  %v1090_v24 = vcombine.high %v1064_v54, %v1072_v56  ;;  %v1106_v28 = vcombine.high %v1080_v57, %v1088_v58 }
 0x2d3   : > { %v989_v5 = vcombine.low %v893_v59, %v900_v60  ;;  %v3285_v6 = vcombine.high %v893_v59, %v900_v60  ;;  %v1005_v7 = vcombine.low %v909_v61, %v916_v62  ;;  %v3286_v8 = vcombine.high %v909_v61, %v916_v62 }
 0x2d4   : > { %v1097_v9 = vrot.slane %v1089_v63, %v4167_v55  ;;  %v1113_v10 = vrot.slane %v1105_v0, %v4167_v55  ;;  %v1104_v31 = vrot.slane %v1090_v24, %v4167_v55  ;;  %v1120_v32 = vrot.slane %v1106_v28, %v4167_v55 }
 0x2d5   : > { %v996_v11 = vrot.slane %v989_v5, %v4163_v49  ;;  %v1004_v12 = vrot.slane %v3285_v6, %v4163_v49  ;;  %v1012_v14 = vrot.slane %v1005_v7, %v4163_v49  ;;  %v1020_v15 = vrot.slane %v3286_v8, %v4163_v49 }
 0x2d6   : > { %v4253_v16 = vcombine.low %v1097_v9, %v1113_v10  ;;  %v4265_v25 = vcombine.high %v1097_v9, %v1113_v10  ;;  %v4283_v33 = vcombine.low %v1104_v31, %v1120_v32  ;;  %v4291_v35 = vcombine.high %v1104_v31, %v1120_v32 }
 0x2d7   : > { %v1021_v17 = vcombine.low %v996_v11, %v1004_v12  ;;  %v1037_v18 = vcombine.low %v1012_v14, %v1020_v15  ;;  %v1022_v21 = vcombine.high %v996_v11, %v1004_v12  ;;  %v1038_v22 = vcombine.high %v1012_v14, %v1020_v15 }
 0x2d8   : > { %1558 = vrot.lane.b32.xlu1 %v4253_v16, %s3861_s14  ;;  %v4298_v43 = vand.u32 127, %v403_v39  ;;  %v407_v46 = vsub.f32 0.0, %v402_v42  ;;  %v406_v50 = vsub.f32 0.0, %v401_v48  ;;  %v1431_v53 = vsel %vm1425_vm1, %v1430_v52, %v4195_v36 }
 0x2d9   : > { %v1029_v19 = vrot.slane %v1021_v17, %v4167_v55  ;;  %v1045_v20 = vrot.slane %v1037_v18, %v4167_v55  ;;  %v1036_v26 = vrot.slane %v1022_v21, %v4167_v55  ;;  %v1052_v27 = vrot.slane %v1038_v22, %v4167_v55 }
 0x2da   : > { %vm405_vm2 = vcmp.lt.s32.totalorder %v4298_v43, 8  ;;  %vm1670_vm5 = vcmp.le.s32.totalorder %v4298_v43, %v4159_v45 }
 0x2db   : > { %v4259_v23 = vcombine.low %v1029_v19, %v1045_v20  ;;  %v4269_v29 = vcombine.high %v1029_v19, %v1045_v20  ;;  %v4275_v30 = vcombine.low %v1036_v26, %v1052_v27  ;;  %v4285_v34 = vcombine.high %v1036_v26, %v1052_v27  ;;  %v1427_v44 = vpop.permute.xlu1 %1426 }
 0x2dc   : > { %1432 = vrot.lane.b32.xlu1 %v4219_v2, %s3861_s14  ;;  %v1428_v47 = vsel %vm1425_vm1, %v1427_v44, %v4217_v1  ;;  %v411_v39 = vsel %vm405_vm2, %v407_v46, %v402_v42  ;;  %v410_v51 = vsel %vm405_vm2, %v406_v50, %v401_v48 }
 0x2dd   : > { %1555 = vrot.lane.b32.xlu0 %v4259_v23, %s3861_s14 }
 0x2e0   : > { %1564 = vrot.lane.b32.xlu1 %v4265_v25, %s3861_s14 }
 0x2e1   : > { %1561 = vrot.lane.b32.xlu0 %v4269_v29, %s3861_s14 }
 0x2e4   : > { %1567 = vrot.lane.b32.xlu1 %v4275_v30, %s3861_s14 }
 0x2e5   : > { %1435 = vrot.lane.b32.xlu0 %v4197_v38, %s3861_s14 }
 0x2e8   : > { %1570 = vrot.lane.b32.xlu1 %v4283_v33, %s3861_s14 }
 0x2e9   : > { %1573 = vrot.lane.b32.xlu0 %v4285_v34, %s3861_s14 }
 0x2ec   : > { %1438 = vrot.lane.b32.xlu1 %v4221_v3, %s3861_s14 }
 0x2ed   : > { %1576 = vrot.lane.b32.xlu0 %v4291_v35, %s3861_s14 }
 0x2f0   : > { %1441 = vrot.lane.b32.xlu1 %v4199_v40, %s3861_s14 }
 0x2f1   : > { %1444 = vrot.lane.b32.xlu0 %v4223_v4, %s3861_s14 }
 0x2f4   : > { %1450 = vrot.lane.b32.xlu1 %v1428_v47, %s3861_s14 }
 0x2f5   : > { %1447 = vrot.lane.b32.xlu0 %v4201_v41, %s3861_s14 }
 0x2f9   : > { %1478 = vrot.lane.b32.xlu0 %v411_v39, %s3862_s23 }
 0x2fd   : > { %1476 = vrot.lane.b32.xlu0 %v410_v51, %s3862_s23 }
 0x301   : > { %1452 = vrot.lane.b32.xlu0 %v1431_v53, %s3861_s14 }
 0x34a   : > { %v1559_v54 = vpop.permute.xlu1 %1558 }
 0x34b   : > { %v1560_v62 = vsel %vm1425_vm1, %v1559_v54, %v4253_v16 }
 0x34e   : > { %v1433_v56 = vpop.permute.xlu1 %1432 }
 0x34f   : > { %v1556_v57 = vpop.permute.xlu0 %1555  ;;  %v1434_v6 = vsel %vm1425_vm1, %v1433_v56, %v4219_v2 }
 0x350   : > { %v1557_v58 = vsel %vm1425_vm1, %v1556_v57, %v4259_v23 }
 0x351   : > { %1579 = vrot.lane.b32.xlu1 %v1557_v58, %s3861_s14 }
 0x352   : > { %v1565_v59 = vpop.permute.xlu1 %1564 }
 0x353   : > { %v1562_v60 = vpop.permute.xlu0 %1561  ;;  %v1566_v10 = vsel %vm1425_vm1, %v1565_v59, %v4265_v25 }
 0x354   : > { %v1563_v61 = vsel %vm1425_vm1, %v1562_v60, %v4269_v29 }
 0x355   : > { %1583 = vrot.lane.b32.xlu0 %v1563_v61, %s3861_s14  ;;  %1581 = vrot.lane.b32.xlu1 %v1560_v62, %s3861_s14 }
 0x356   : > { %v1568_v63 = vpop.permute.xlu1 %1567 }
 0x357   : > { %v1436_v0 = vpop.permute.xlu0 %1435  ;;  %v1569_v15 = vsel %vm1425_vm1, %v1568_v63, %v4275_v30 }
 0x358   : > { %v1437_v5 = vsel %vm1425_vm1, %v1436_v0, %v4197_v38 }
 0x359   : > { %1456 = vrot.lane.b32.xlu0 %v1437_v5, %s3861_s14  ;;  %1454 = vrot.lane.b32.xlu1 %v1434_v6, %s3861_s14 }
 0x35a   : > { %v1571_v7 = vpop.permute.xlu1 %1570 }
 0x35b   : > { %v1574_v8 = vpop.permute.xlu0 %1573  ;;  %v1572_v19 = vsel %vm1425_vm1, %v1571_v7, %v4283_v33 }
 0x35c   : > { %v1575_v9 = vsel %vm1425_vm1, %v1574_v8, %v4285_v34 }
 0x35d   : > { %1591 = vrot.lane.b32.xlu0 %v1575_v9, %s3861_s14  ;;  %1585 = vrot.lane.b32.xlu1 %v1566_v10, %s3861_s14 }
 0x35e   : > { %v1439_v12 = vpop.permute.xlu1 %1438 }
 0x35f   : > { %v1577_v11 = vpop.permute.xlu0 %1576  ;;  %v1440_v24 = vsel %vm1425_vm1, %v1439_v12, %v4221_v3 }
 0x360   : > { %v1578_v14 = vsel %vm1425_vm1, %v1577_v11, %v4291_v35 }
 0x361   : > { %1593 = vrot.lane.b32.xlu0 %v1578_v14, %s3861_s14  ;;  %1587 = vrot.lane.b32.xlu1 %v1569_v15, %s3861_s14 }
 0x362   : > { %v1442_v20 = vpop.permute.xlu1 %1441 }
 0x363   : > { %v1445_v17 = vpop.permute.xlu0 %1444  ;;  %v1443_v28 = vsel %vm1425_vm1, %v1442_v20, %v4199_v40 }
 0x364   : > { %v1446_v18 = vsel %vm1425_vm1, %v1445_v17, %v4223_v4 }
 0x365   : > { %1462 = vrot.lane.b32.xlu0 %v1446_v18, %s3861_s14  ;;  %1589 = vrot.lane.b32.xlu1 %v1572_v19, %s3861_s14 }
 0x366   : > { %v1451_v27 = vpop.permute.xlu1 %1450 }
 0x367   : > { %v1448_v21 = vpop.permute.xlu0 %1447  ;;  %v1466_v31 = vsel %vm1425_vm1, %v1451_v27, %v4217_v1 }
 0x368   : > { %v1449_v22 = vsel %vm1425_vm1, %v1448_v21, %v4201_v41 }
 0x369   : > { %1464 = vrot.lane.b32.xlu0 %v1449_v22, %s3861_s14  ;;  %1458 = vrot.lane.b32.xlu1 %v1440_v24, %s3861_s14 }
 0x36b   : > { %v4354_v26 = vpop.permute.xlu0 %1478 }
 0x36d   : > { %1460 = vrot.lane.b32.xlu1 %v1443_v28, %s3861_s14 }
 0x36f   : > { %v1477_v32 = vpop.permute.xlu0 %1476 }
 0x370   : > { %v1482_v42 = vmul.f32 %v1477_v32, %v1466_v31 }
 0x372   : > { %1498 = vrot.lane.b32.xlu1 %v1482_v42, %s3863_s20 }
 0x373   : > { %v1453_v44 = vpop.permute.xlu0 %1452 }
 0x374   : > { %v1467_v46 = vsel %vm1425_vm1, %v1453_v44, %v4195_v36 }
 0x375   : > { %v1483_v47 = vmul.f32 %v4354_v26, %v1467_v46 }
 0x377   : > { %1500 = vrot.lane.b32.xlu0 %v1483_v47, %s3863_s20 }
 0x3c3   : > { %v1580_v48 = vpop.permute.xlu1 %1579 }
 0x3c4   : > { %v1595_v39 = vsel %vm1425_vm1, %v1580_v48, %v4259_v23 }
 0x3c5   : > { %v1603_v50 = vmul.f32 %v1595_v39, %v1477_v32  ;;  %v4413_v39 = vld [vmem:[#allocation11] sm:$0xff] }
 0x3c7   : > { %v1584_v51 = vpop.permute.xlu0 %1583  ;;  %1619 = vrot.lane.b32.xlu0 %v1603_v50, %s3863_s20  ;;  %v1582_v52 = vpop.permute.xlu1 %1581 }
 0x3c8   : > { %v1597_v53 = vsel %vm1425_vm1, %v1584_v51, %v4269_v29  ;;  %v1596_v54 = vsel %vm1425_vm1, %v1582_v52, %v4253_v16  ;;  %v4416_v51 = vpop.f32.mrf.mxu1 }
 0x3c9   : > { %v1605_v56 = vmul.f32 %v1597_v53, %v1477_v32  ;;  %v1604_v57 = vmul.f32 %v1596_v54, %v4354_v26  ;;  %v4423_v54 = vld [vmem:[#allocation11 + $0x8] sm:$0xff] }
 0x3cb   : > { %v1457_v58 = vpop.permute.xlu0 %1456  ;;  %1623 = vrot.lane.b32.xlu0 %v1605_v56, %s3863_s20  ;;  %1621 = vrot.lane.b32.xlu1 %v1604_v57, %s3863_s20  ;;  %v1455_v59 = vpop.permute.xlu1 %1454 }
 0x3cc   : > { %v1469_v60 = vsel %vm1425_vm1, %v1457_v58, %v4197_v38  ;;  %v1468_v61 = vsel %vm1425_vm1, %v1455_v59, %v4219_v2 }
 0x3cd   : > { %v1485_v62 = vmul.f32 %v4354_v26, %v1469_v60  ;;  %v1484_v63 = vmul.f32 %v1477_v32, %v1468_v61  ;;  %v1547_v60 = vmul.f32 %v4259_v23, %v4413_v39  ;;  %v1420_v23 = vmul.f32 %v4197_v38, %v4423_v54 }
 0x3cf   : > { %v1592_v0 = vpop.permute.xlu0 %1591  ;;  %1504 = vrot.lane.b32.xlu0 %v1485_v62, %s3863_s20  ;;  %1502 = vrot.lane.b32.xlu1 %v1484_v63, %s3863_s20  ;;  %v1586_v5 = vpop.permute.xlu1 %1585  ;;  %v1549_v62 = vmul.f32 %v4269_v29, %v4413_v39  ;;  %v1548_v63 = vmul.f32 %v4253_v16, %v4423_v54 }
 0x3d0   : > { %v1601_v6 = vsel %vm1425_vm1, %v1592_v0, %v4285_v34  ;;  %v1598_v7 = vsel %vm1425_vm1, %v1586_v5, %v4265_v25 }
 0x3d1   : > { %v1609_v8 = vmul.f32 %v1601_v6, %v1477_v32  ;;  %v1606_v9 = vmul.f32 %v1598_v7, %v4354_v26 }
 0x3d3   : > { %v1594_v10 = vpop.permute.xlu0 %1593  ;;  %1631 = vrot.lane.b32.xlu0 %v1609_v8, %s3863_s20  ;;  %1625 = vrot.lane.b32.xlu1 %v1606_v9, %s3863_s20  ;;  %v1588_v11 = vpop.permute.xlu1 %1587  ;;  %v1419_v8 = vmul.f32 %v4219_v2, %v4413_v39 }
 0x3d4   : > { %v1602_v12 = vsel %vm1425_vm1, %v1594_v10, %v4291_v35  ;;  %v1599_v14 = vsel %vm1425_vm1, %v1588_v11, %v4275_v30 }
 0x3d5   : > { %v1610_v15 = vmul.f32 %v1602_v12, %v4354_v26  ;;  %v1607_v17 = vmul.f32 %v1599_v14, %v1477_v32  ;;  %v1553_v14 = vmul.f32 %v4285_v34, %v4413_v39  ;;  %v1554_v34 = vmul.f32 %v4291_v35, %v4423_v54 }
 0x3d6   : > { %v1552_v35 = vmul.f32 %v4283_v33, %v4423_v54 }
 0x3d7   : > { %v1463_v18 = vpop.permute.xlu0 %1462  ;;  %1633 = vrot.lane.b32.xlu0 %v1610_v15, %s3863_s20  ;;  %1627 = vrot.lane.b32.xlu1 %v1607_v17, %s3863_s20  ;;  %v1590_v19 = vpop.permute.xlu1 %1589  ;;  %v1550_v15 = vmul.f32 %v4265_v25, %v4423_v54  ;;  %v1551_v25 = vmul.f32 %v4275_v30, %v4413_v39 }
 0x3d8   : > { %v1472_v20 = vsel %vm1425_vm1, %v1463_v18, %v4223_v4  ;;  %v1600_v21 = vsel %vm1425_vm1, %v1590_v19, %v4283_v33  ;;  %v1421_v33 = vmul.f32 %v4221_v3, %v4413_v39 }
 0x3d9   : > { %v1488_v22 = vmul.f32 %v1477_v32, %v1472_v20  ;;  %v1608_v24 = vmul.f32 %v1600_v21, %v4354_v26 }
 0x3db   : > { %v1465_v27 = vpop.permute.xlu0 %1464  ;;  %1510 = vrot.lane.b32.xlu0 %v1488_v22, %s3863_s20  ;;  %1629 = vrot.lane.b32.xlu1 %v1608_v24, %s3863_s20  ;;  %v1459_v28 = vpop.permute.xlu1 %1458 }
 0x3dc   : > { %v1473_v31 = vsel %vm1425_vm1, %v1465_v27, %v4201_v41  ;;  %v1470_v42 = vsel %vm1425_vm1, %v1459_v28, %v4221_v3  ;;  %v1423_v28 = vmul.f32 %v4223_v4, %v4413_v39  ;;  %v1424_v4 = vmul.f32 %v4201_v41, %v4423_v54 }
 0x3dd   : > { %v1489_v44 = vmul.f32 %v4354_v26, %v1473_v31  ;;  %v1486_v46 = vmul.f32 %v1477_v32, %v1470_v42  ;;  %v1417_v32 = vmul.f32 %v4217_v1, %v4413_v39  ;;  %v1422_v41 = vmul.f32 %v4199_v40, %v4423_v54 }
 0x3df   : > { %1512 = vrot.lane.b32.xlu0 %v1489_v44, %s3863_s20  ;;  %1506 = vrot.lane.b32.xlu1 %v1486_v46, %s3863_s20  ;;  %v1461_v47 = vpop.permute.xlu1 %1460 }
 0x3e0   : > { %v1471_v48 = vsel %vm1425_vm1, %v1461_v47, %v4199_v40 }
 0x3e1   : > { %v1487_v50 = vmul.f32 %v4354_v26, %v1471_v48  ;;  %v1418_v26 = vmul.f32 %v4195_v36, %v4423_v54 }
 0x3e3   : > { %1508 = vrot.lane.b32.xlu1 %v1487_v50, %s3863_s20  ;;  %1129 = vrot.lane.b32.xlu0 %v4416_v51, %s3856_s25 }
 0x3e4   : > { %v1499_v52 = vpop.permute.xlu1 %1498 }
 0x3e5   : > { %v1522_v53 = vadd.f32 %v1499_v52, %v1417_v32 }
 0x3e7   : > { %v1530_v56 = vmul.f32 0.25, %v1522_v53  ;;  %1135 = vrot.lane.b32.xlu1 %v4416_v51, %s3857_s15  ;;  %1127 = vrot.lane.b32.xlu0 %v4144_v37, %s3856_s25  ;;  %s394_s25 = scalar_lea.vmem [#allocation14], %s3273_s8 }
 0x3e9   : > { %1539 = vst.msk [vmem:[#allocation2] sm:$0xff] %vm1538_vm3, %v1530_v56  ;;  %v1501_v57 = vpop.permute.xlu0 %1500 }
 0x3ea   : > { %v1523_v58 = vadd.f32 %v1501_v57, %v1418_v26 }
 0x3eb   : > { %1141 = vrot.lane.b32.xlu1 %v4416_v51, %s3855_s22 }
 0x3ec   : > { %v1531_v1 = vmul.f32 0.25, %v1523_v58 }
 0x3ee   : > { %1540 = vst.msk [vmem:[#allocation2 + $0x8] sm:$0xff] %vm1538_vm3, %v1531_v1 }
 0x3ef   : > { %1133 = vrot.lane.b32.xlu1 %v4144_v37, %s3857_s15  ;;  %s3866_s15 = smov 48  }
 0x3f0   : > { %v1674_v59 = vld [vmem:[#allocation2] sm:$0xff] }
 0x3f1   : > { %3399 = vmatprep.mubr.msk.f32.mxu1 %vm1538_vm3, %v1674_v59 }
 0x3f5   : > { %v1675_v46 = vld [vmem:[#allocation2 + $0x8] sm:$0xff] }
 0x439   : > { %v1620_v36 = vpop.permute.xlu0 %1619 }
 0x43a   : > { %v1643_v61 = vadd.f32 %v1620_v36, %v1547_v60 }
 0x43c   : > { %1651 = vst.msk [vmem:[#allocation3] sm:$0xff] %vm1538_vm3, %v1643_v61 }
 0x43d   : > { %v1624_v0 = vpop.permute.xlu0 %1623  ;;  %v1622_v5 = vpop.permute.xlu1 %1621 }
 0x43e   : > { %v1645_v6 = vadd.f32 %v1624_v0, %v1549_v62  ;;  %v1644_v7 = vadd.f32 %v1622_v5, %v1548_v63 }
 0x440   : > { %1653 = vst.msk [vmem:[#allocation3 + $0x10] sm:$0xff] %vm1538_vm3, %v1645_v6  ;;  %1652 = vst.msk [vmem:[#allocation3 + $0x8] sm:$0xff] %vm1538_vm3, %v1644_v7 }
 0x441   : > { %v1505_v9 = vpop.permute.xlu0 %1504  ;;  %v1503_v10 = vpop.permute.xlu1 %1502 }
 0x442   : > { %v1525_v29 = vadd.f32 %v1505_v9, %v1420_v23  ;;  %v1524_v11 = vadd.f32 %v1503_v10, %v1419_v8 }
 0x443   : > { %v1682_v22 = vld [vmem:[#allocation3] sm:$0xff] }
 0x444   : > { %v1533_v12 = vmul.f32 0.25, %v1525_v29  ;;  %v1532_v16 = vmul.f32 0.25, %v1524_v11 }
 0x445   : > { %v1632_v17 = vpop.permute.xlu0 %1631  ;;  %v1626_v18 = vpop.permute.xlu1 %1625 }
 0x446   : > { %1542 = vst.msk [vmem:[#allocation2 + $0x18] sm:$0xff] %vm1538_vm3, %v1533_v12  ;;  %1541 = vst.msk [vmem:[#allocation2 + $0x10] sm:$0xff] %vm1538_vm3, %v1532_v16  ;;  %v1649_v38 = vadd.f32 %v1632_v17, %v1553_v14  ;;  %v1646_v2 = vadd.f32 %v1626_v18, %v1550_v15 }
 0x447   : > { %v1683_v19 = vld [vmem:[#allocation3 + $0x8] sm:$0xff]  ;;  %v1684_v53 = vld [vmem:[#allocation3 + $0x10] sm:$0xff] }
 0x448   : > { %1657 = vst.msk [vmem:[#allocation3 + $0x30] sm:$0xff] %vm1538_vm3, %v1649_v38  ;;  %1654 = vst.msk [vmem:[#allocation3 + $0x18] sm:$0xff] %vm1538_vm3, %v1646_v2  ;;  %3395 = vmatprep.subr.msk.mxu1 %vm1538_vm3, %v1683_v19 }
 0x449   : > { %v1634_v20 = vpop.permute.xlu0 %1633  ;;  %3396 = vmatpush3.xpose.msk.msra.mxu1 %vm1538_vm3, %v1683_v19  ;;  %v1628_v21 = vpop.permute.xlu1 %1627 }
 0x44a   : > { %v1650_v24 = vadd.f32 %v1634_v20, %v1554_v34  ;;  %v1647_v27 = vadd.f32 %v1628_v21, %v1551_v25  ;;  %3397 = vmatprep.subr.msk.mxu1 %vm1538_vm3, %v1682_v22 }
 0x44c   : > { %1658 = vst.msk [vmem:[#allocation3 + $0x38] sm:$0xff] %vm1538_vm3, %v1650_v24  ;;  %1655 = vst.msk [vmem:[#allocation3 + $0x20] sm:$0xff] %vm1538_vm3, %v1647_v27 }
 0x44d   : > { %v1511_v30 = vpop.permute.xlu0 %1510  ;;  %3398 = vmatpush3.xpose.msk.msra.mxu1 %vm1538_vm3, %v1682_v22  ;;  %v1630_v31 = vpop.permute.xlu1 %1629  ;;  %v1676_v50 = vld [vmem:[#allocation2 + $0x10] sm:$0xff]  ;;  %v1677_v59 = vld [vmem:[#allocation2 + $0x18] sm:$0xff] }
 0x44e   : > { %v1528_v42 = vadd.f32 %v1511_v30, %v1423_v28  ;;  %v1648_v44 = vadd.f32 %v1630_v31, %v1552_v35 }
 0x44f   : > { %v1685_v47 = vld [vmem:[#allocation3 + $0x18] sm:$0xff]  ;;  %v1688_v61 = vld [vmem:[#allocation3 + $0x30] sm:$0xff] }
 0x450   : > { %v1536_v48 = vmul.f32 0.25, %v1528_v42  ;;  %1656 = vst.msk [vmem:[#allocation3 + $0x28] sm:$0xff] %vm1538_vm3, %v1648_v44  ;;  %3400 = vmatmul.mubr.msk.f32.vlgmr.msra.gmra.mxu1 %vm1538_vm3, %v1675_v46  ;;  %3402 = vmatprep.subr.msk.mxu1 %vm1538_vm3, %v1685_v47 }
 0x451   : > { %v1513_v32 = vpop.permute.xlu0 %1512  ;;  %3403 = vmatpush3.xpose.msk.msra.mxu1 %vm1538_vm3, %v1685_v47  ;;  %3406 = vmatprep.mubr.msk.f32.mxu1 %vm1538_vm3, %v1676_v50  ;;  %v1507_v52 = vpop.permute.xlu1 %1506 }
 0x452   : > { %1545 = vst.msk [vmem:[#allocation2 + $0x30] sm:$0xff] %vm1538_vm3, %v1536_v48  ;;  %v1529_v56 = vadd.f32 %v1513_v32, %v1424_v4  ;;  %v1526_v26 = vadd.f32 %v1507_v52, %v1421_v33  ;;  %3404 = vmatprep.subr.msk.mxu1 %vm1538_vm3, %v1684_v53 }
 0x453   : > { %v1689_v39 = vld [vmem:[#allocation3 + $0x38] sm:$0xff]  ;;  %v1686_v54 = vld [vmem:[#allocation3 + $0x20] sm:$0xff] }
 0x454   : > { %v1537_v57 = vmul.f32 0.25, %v1529_v56  ;;  %v1534_v58 = vmul.f32 0.25, %v1526_v26  ;;  %v1669_v56 = vadd.s32 8, %v4159_v45  ;;  %v3864_v26 = vmov -1e+30  }
 0x455   : > { %3405 = vmatpush3.xpose.msk.msra.mxu1 %vm1538_vm3, %v1684_v53  ;;  %v1509_v3 = vpop.permute.xlu1 %1508  ;;  %v1130_v5 = vpop.permute.xlu0 %1129 }
 0x456   : > { %1546 = vst.msk [vmem:[#allocation2 + $0x38] sm:$0xff] %vm1538_vm3, %v1537_v57  ;;  %1543 = vst.msk [vmem:[#allocation2 + $0x20] sm:$0xff] %vm1538_vm3, %v1534_v58  ;;  %v1527_v1 = vadd.f32 %v1509_v3, %v1422_v41  ;;  %3416 = vmatprep.subr.msk.mxu1 %vm1538_vm3, %v1689_v39  ;;  %vm1671_vm4 = vcmp.le.s32.totalorder %v4298_v43, %v1669_v56  ;;  %v1672_v41 = vsel %vm1670_vm5, 0.0, %v3864_v26 }
 0x457   : > { %v1687_v60 = vld [vmem:[#allocation3 + $0x28] sm:$0xff]  ;;  %v1673_v57 = vsel %vm1671_vm4, 0.0, %v3864_v26 }
 0x458   : > { %v1535_v36 = vmul.f32 0.25, %v1527_v1  ;;  %3407 = vmatmul.mubr.msk.f32.vlgmr.msra.gmra.mxu1 %vm1538_vm3, %v1677_v59  ;;  %3409 = vmatprep.subr.msk.mxu0 %vm1538_vm3, %v1687_v60 }
 0x459   : > { %3410 = vmatpush3.xpose.msk.msra.mxu0 %vm1538_vm3, %v1687_v60  ;;  %3417 = vmatpush3.xpose.msk.msra.mxu1 %vm1538_vm3, %v1689_v39  ;;  %v1136_v40 = vpop.permute.xlu1 %1135  ;;  %v1680_v62 = vld [vmem:[#allocation2 + $0x30] sm:$0xff] }
 0x45a   : > { %1544 = vst.msk [vmem:[#allocation2 + $0x28] sm:$0xff] %vm1538_vm3, %v1535_v36  ;;  %3411 = vmatprep.subr.msk.mxu0 %vm1538_vm3, %v1686_v54  ;;  %3418 = vmatprep.subr.msk.mxu1 %vm1538_vm3, %v1688_v61  ;;  %v1213_v63 = vcombine.low %v4416_v51, %v1136_v40  ;;  %v1214_v0 = vcombine.high %v4416_v51, %v1136_v40 }
 0x45b   : > { %3420 = vmatprep.mubr.msk.f32.mxu1 %vm1538_vm3, %v1680_v62 }
 0x45c   : > { %v1221_v10 = vrot.slane %v1213_v63, %v4163_v49  ;;  %v1228_v29 = vrot.slane %v1214_v0, %v4163_v49 }
 0x45d   : > { %3412 = vmatpush3.xpose.msk.msra.mxu0 %vm1538_vm3, %v1686_v54  ;;  %3419 = vmatpush3.xpose.msk.msra.mxu1 %vm1538_vm3, %v1688_v61  ;;  %v1142_v6 = vpop.permute.xlu1 %1141  ;;  %v1678_v7 = vld [vmem:[#allocation2 + $0x20] sm:$0xff]  ;;  %v1681_v9 = vld [vmem:[#allocation2 + $0x38] sm:$0xff] }
 0x45e   : > { %v1229_v23 = vcombine.low %v1130_v5, %v1142_v6  ;;  %v1230_v8 = vcombine.high %v1130_v5, %v1142_v6  ;;  %3413 = vmatprep.mubr.msk.f32.mxu0 %vm1538_vm3, %v1678_v7 }
 0x460   : > { %v1237_v11 = vrot.slane %v1229_v23, %v4163_v49  ;;  %v1244_v51 = vrot.slane %v1230_v8, %v4163_v49  ;;  %3421 = vmatmul.mubr.msk.f32.vlgmr.msra.gmra.mxu1 %vm1538_vm3, %v1681_v9 }
 0x461   : > { %v1679_v12 = vld [vmem:[#allocation2 + $0x28] sm:$0xff] }
 0x462   : > { %v1245_v16 = vcombine.low %v1221_v10, %v1237_v11  ;;  %v1246_v14 = vcombine.high %v1221_v10, %v1237_v11  ;;  %v1261_v15 = vcombine.low %v1228_v29, %v1244_v51  ;;  %v1262_v17 = vcombine.high %v1228_v29, %v1244_v51  ;;  %3414 = vmatmul.mubr.msk.f32.vlgmr.msra.gmra.mxu0 %vm1538_vm3, %v1679_v12  ;;  %v1128_v51 = vpop.permute.xlu0 %1127  ;;  %v1134_v12 = vpop.permute.xlu1 %1133 }
 0x464   : > { %v1253_v18 = vrot.slane %v1245_v16, %v4167_v55  ;;  %v1260_v38 = vrot.slane %v1246_v14, %v4167_v55  ;;  %v1269_v2 = vrot.slane %v1261_v15, %v4167_v55  ;;  %v1276_v19 = vrot.slane %v1262_v17, %v4167_v55 }
 0x466   : > { %v1349_v34 = vcombine.low %v1253_v18, %v1260_v38  ;;  %v3291_v25 = vcombine.high %v1253_v18, %v1260_v38  ;;  %v1365_v20 = vcombine.low %v1269_v2, %v1276_v19  ;;  %v3292_v21 = vcombine.high %v1269_v2, %v1276_v19 }
 0x468   : > { %v1356_v22 = vrot.slane %v1349_v34, %v4163_v49  ;;  %v1364_v24 = vrot.slane %v3291_v25, %v4163_v49  ;;  %v1372_v27 = vrot.slane %v1365_v20, %v4163_v49  ;;  %v1380_v28 = vrot.slane %v3292_v21, %v4163_v49 }
 0x46a   : > { %v1381_v35 = vcombine.low %v1356_v22, %v1364_v24  ;;  %v1382_v30 = vcombine.high %v1356_v22, %v1364_v24  ;;  %v1397_v31 = vcombine.low %v1372_v27, %v1380_v28  ;;  %v1398_v42 = vcombine.high %v1372_v27, %v1380_v28 }
 0x46c   : > { %v1389_v44 = vrot.slane %v1381_v35, %v4167_v55  ;;  %v1396_v46 = vrot.slane %v1382_v30, %v4167_v55  ;;  %v1405_v47 = vrot.slane %v1397_v31, %v4167_v55  ;;  %v1412_v48 = vrot.slane %v1398_v42, %v4167_v55 }
 0x46e   : > { %v1413_v4 = vcombine.low %v1389_v44, %v1405_v47  ;;  %v1414_v50 = vcombine.high %v1389_v44, %v1405_v47  ;;  %v1415_v33 = vcombine.low %v1396_v46, %v1412_v48  ;;  %v1416_v32 = vcombine.high %v1396_v46, %v1412_v48 }
 0x470   : > { %1660 = vst.msk [vmem:[#allocation4 + $0x8] sm:$0xff] %vm1538_vm3, %v1413_v4  ;;  %1662 = vst.msk [vmem:[#allocation4 + $0x18] sm:$0xff] %vm1538_vm3, %v1414_v50  ;;  %v1145_v50 = vcombine.low %v4144_v37, %v1134_v12 }
 0x471   : > { %1664 = vst.msk [vmem:[#allocation4 + $0x28] sm:$0xff] %vm1538_vm3, %v1415_v33  ;;  %1666 = vst.msk [vmem:[#allocation4 + $0x38] sm:$0xff] %vm1538_vm3, %v1416_v32  ;;  %v1146_v33 = vcombine.high %v4144_v37, %v1134_v12 }
 0x477   : > { %v1691_v52 = vld [vmem:[#allocation4 + $0x8] sm:$0xff]  ;;  %v1693_v53 = vld [vmem:[#allocation4 + $0x18] sm:$0xff] }
 0x478   : > { %3423 = vmatprep.subr.mxu0 %v1691_v52  ;;  %3430 = vmatprep.subr.mxu1 %v1693_v53 }
 0x479   : > { %3424 = vmatpush3.msra.mxu0 %v1691_v52  ;;  %3431 = vmatpush3.msra.mxu1 %v1693_v53 }
 0x510   : > { %v3401_v58 = vpop.f32.mrf.mxu1 }
 0x511   : > { %v1782_v3 = vadd.f32 %v3401_v58, %v1673_v57 }
 0x512   : > { %v1776_v39 = vpop.f32.mrf.mxu1 }
 0x513   : > { %v1777_v1 = vadd.f32 %v1776_v39, %v1672_v41  ;;  %v2049_v59 = vsel %vm1538_vm3, %v1782_v3, -inf  ;;  %v1153_v39 = vrot.slane %v1145_v50, %v4163_v49 }
 0x514   : > { %2050 = vmax.xlane.f32.xlu0 %v2049_v59 }
 0x515   : > { %v2046_v60 = vsel %vm1538_vm3, %v1777_v1, -inf }
 0x516   : > { %2047 = vmax.xlane.f32.xlu1 %v2046_v60 }
 0x518   : > { %v3408_v36 = vpop.f32.mrf.mxu1 }
 0x519   : > { %v1869_v40 = vadd.f32 %v3408_v36, %v1673_v57 }
 0x51a   : > { %v1863_v61 = vpop.f32.mrf.mxu1 }
 0x51b   : > { %v2055_v54 = vsel %vm1538_vm3, %v1869_v40, -inf  ;;  %v1864_v23 = vadd.f32 %v1863_v61, %v1672_v41 }
 0x51c   : > { %2056 = vmax.xlane.f32.xlu1 %v2055_v54 }
 0x51d   : > { %v2052_v10 = vsel %vm1538_vm3, %v1864_v23, -inf }
 0x520   : > { %v3422_v45 = vpop.f32.mrf.mxu1 }
 0x521   : > { %v4538_v29 = vadd.f32 %v3422_v45, %v1673_v57 }
 0x522   : > { %v3415_v43 = vpop.f32.mrf.mxu0  ;;  %v2037_v62 = vpop.f32.mrf.mxu1 }
 0x523   : > { %v2038_v63 = vadd.f32 %v2037_v62, %v1672_v41  ;;  %v1956_v5 = vadd.f32 %v3415_v43, %v1673_v57  ;;  %v2067_v11 = vsel %vm1538_vm3, %v4538_v29, -inf }
 0x524   : > { %v1950_v0 = vpop.f32.mrf.mxu0 }
 0x525   : > { %v1951_v6 = vadd.f32 %v1950_v0, %v1672_v41  ;;  %v2064_v7 = vsel %vm1538_vm3, %v2038_v63, -inf  ;;  %v2061_v9 = vsel %vm1538_vm3, %v1956_v5, -inf }
 0x526   : > { %2065 = vmax.xlane.f32.xlu1 %v2064_v7 }
 0x527   : > { %v2058_v8 = vsel %vm1538_vm3, %v1951_v6, -inf }
 0x528   : > { %2059 = vmax.xlane.f32.xlu0 %v2058_v8 }
 0x52a   : > { %2062 = vmax.xlane.f32.xlu1 %v2061_v9 }
 0x52c   : > { %2053 = vmax.xlane.f32.xlu0 %v2052_v10 }
 0x542   : > { %1139 = vrot.lane.b32.xlu0 %v4144_v37, %s3855_s22 }
 0x561   : > { %2068 = vmax.xlane.f32.xlu0 %v2067_v11 }
 0x59d   : > { %v4542_v16 = vpop.xlane.xlu0 %2050 }
 0x59e   : > { %v2071_v14 = vmax.f32 %v4542_v16, -1e+30 }
 0x59f   : > { %v4545_v15 = vpop.xlane.xlu1 %2047 }
 0x5a0   : > { %v2103_v17 = vsub.f32 %v1782_v3, %v2071_v14  ;;  %v2070_v18 = vmax.f32 %v4545_v15, -1e+30 }
 0x5a2   : > { %v2112_v38 = vmul.f32 1.442695, %v2103_v17  ;;  %v2102_v2 = vsub.f32 %v1777_v1, %v2070_v18  ;;  %v1160_v1 = vrot.slane %v1146_v33, %v4163_v49 }
 0x5a4   : > { %v2110_v19 = vmul.f32 1.442695, %v2102_v2  ;;  %3604 = vpow2.f32 %v2112_v38 }
 0x5a5   : > { %v4552_v34 = vpop.xlane.xlu1 %2056 }
 0x5a6   : > { %v2073_v25 = vmax.f32 %v4552_v34, -1e+30  ;;  %3606 = vpow2.f32 %v2110_v19 }
 0x5a8   : > { %v2105_v20 = vsub.f32 %v1869_v40, %v2073_v25 }
 0x5aa   : > { %v2116_v21 = vmul.f32 1.442695, %v2105_v20 }
 0x5ac   : > { %3608 = vpow2.f32 %v2116_v21 }
 0x5af   : > { %v4557_v22 = vpop.xlane.xlu1 %2065 }
 0x5b0   : > { %v2076_v42 = vmax.f32 %v4557_v22, -1e+30 }
 0x5b1   : > { %v4559_v24 = vpop.xlane.xlu0 %2059  ;;  %v4561_v27 = vpop.eup %3604 }
 0x5b2   : > { %v2074_v28 = vmax.f32 %v4559_v24, -1e+30  ;;  %v2137_v35 = vsel %vm1538_vm3, %v4561_v27, 0.0  ;;  %v2108_v53 = vsub.f32 %v2038_v63, %v2076_v42 }
 0x5b3   : > { %v4566_v30 = vpop.xlane.xlu1 %2062  ;;  %v3607_v31 = vpop.eup %3606  ;;  %2138 = vadd.xlane.f32.xlu0 %v2137_v35 }
 0x5b4   : > { %v2106_v44 = vsub.f32 %v1951_v6, %v2074_v28  ;;  %v2075_v46 = vmax.f32 %v4566_v30, -1e+30  ;;  %3427 = vmatprep.mubr.msk.f32.mxu0 %vm1538_vm3, %v3607_v31  ;;  %v2134_v52 = vsel %vm1538_vm3, %v3607_v31, 0.0  ;;  %v2122_v60 = vmul.f32 1.442695, %v2108_v53 }
 0x5b5   : > { %v4573_v47 = vpop.xlane.xlu0 %2053 }
 0x5b6   : > { %v2118_v48 = vmul.f32 1.442695, %v2106_v44  ;;  %v2072_v4 = vmax.f32 %v4573_v47, -1e+30  ;;  %v2107_v32 = vsub.f32 %v1956_v5, %v2075_v46 }
 0x5b7   : > { %2135 = vadd.xlane.f32.xlu0 %v2134_v52 }
 0x5b8   : > { %v2104_v56 = vsub.f32 %v1864_v23, %v2072_v4  ;;  %3610 = vpow2.f32 %v2118_v48  ;;  %v2120_v26 = vmul.f32 1.442695, %v2107_v32 }
 0x5b9   : > { %v1140_v57 = vpop.permute.xlu0 %1139  ;;  %v4585_v58 = vpop.eup %3608 }
 0x5ba   : > { %v2114_v41 = vmul.f32 1.442695, %v2104_v56  ;;  %v1161_v3 = vcombine.low %v1128_v51, %v1140_v57  ;;  %v1162_v37 = vcombine.high %v1128_v51, %v1140_v57  ;;  %v2143_v59 = vsel %vm1538_vm3, %v4585_v58, 0.0 }
 0x5bb   : > { %3612 = vpow2.f32 %v2120_v26  ;;  %2144 = vadd.xlane.f32.xlu1 %v2143_v59 }
 0x5bc   : > { %v1169_v36 = vrot.slane %v1161_v3, %v4163_v49  ;;  %v1176_v40 = vrot.slane %v1162_v37, %v4163_v49  ;;  %3614 = vpow2.f32 %v2114_v41 }
 0x5bd   : > { %3616 = vpow2.f32 %v2122_v60 }
 0x5be   : > { %v1177_v54 = vcombine.low %v1153_v39, %v1169_v36  ;;  %v1178_v61 = vcombine.high %v1153_v39, %v1169_v36  ;;  %v1193_v45 = vcombine.low %v1160_v1, %v1176_v40  ;;  %v1194_v43 = vcombine.high %v1160_v1, %v1176_v40  ;;  %v1695_v39 = vld [vmem:[#allocation4 + $0x28] sm:$0xff]  ;;  %v1697_v1 = vld [vmem:[#allocation4 + $0x38] sm:$0xff] }
 0x5c0   : > { %v1185_v62 = vrot.slane %v1177_v54, %v4167_v55  ;;  %v1192_v63 = vrot.slane %v1178_v61, %v4167_v55  ;;  %v1201_v0 = vrot.slane %v1193_v45, %v4167_v55  ;;  %v1208_v5 = vrot.slane %v1194_v43, %v4167_v55 }
 0x5c1   : > { %v2079_v45 = vsub.f32 -1e+30, %v2071_v14  ;;  %v2083_v43 = vsub.f32 -1e+30, %v2075_v46 }
 0x5c2   : > { %v1281_v6 = vcombine.low %v1185_v62, %v1192_v63  ;;  %v3289_v7 = vcombine.high %v1185_v62, %v1192_v63  ;;  %v1297_v23 = vcombine.low %v1201_v0, %v1208_v5  ;;  %v3290_v8 = vcombine.high %v1201_v0, %v1208_v5 }
 0x5c3   : > { %v2078_v62 = vsub.f32 -1e+30, %v2070_v18  ;;  %v2088_v63 = vmul.f32 1.442695, %v2079_v45  ;;  %v2096_v0 = vmul.f32 1.442695, %v2083_v43 }
 0x5c4   : > { %v1288_v9 = vrot.slane %v1281_v6, %v4163_v49  ;;  %v1296_v10 = vrot.slane %v3289_v7, %v4163_v49  ;;  %v1304_v11 = vrot.slane %v1297_v23, %v4163_v49  ;;  %v1312_v51 = vrot.slane %v3290_v8, %v4163_v49 }
 0x5c5   : > { %v3611_v12 = vpop.eup %3610  ;;  %v2086_v5 = vmul.f32 1.442695, %v2078_v62 }
 0x5c6   : > { %v1313_v17 = vcombine.low %v1288_v9, %v1296_v10  ;;  %v1314_v38 = vcombine.high %v1288_v9, %v1296_v10  ;;  %v1329_v2 = vcombine.low %v1304_v11, %v1312_v51  ;;  %v1330_v19 = vcombine.high %v1304_v11, %v1312_v51 }
 0x5c7   : > { %v2146_v20 = vsel %vm1538_vm3, %v3611_v12, 0.0 }
 0x5c8   : > { %v1321_v21 = vrot.slane %v1313_v17, %v4167_v55  ;;  %v1328_v35 = vrot.slane %v1314_v38, %v4167_v55  ;;  %2147 = vadd.xlane.f32.xlu0 %v2146_v20  ;;  %v3613_v31 = vpop.eup %3612  ;;  %v1337_v44 = vrot.slane %v1329_v2, %v4167_v55  ;;  %v1344_v48 = vrot.slane %v1330_v19, %v4167_v55 }
 0x5c9   : > { %v2149_v50 = vsel %vm1538_vm3, %v3613_v31, 0.0  ;;  %v3615_v33 = vpop.eup %3614  ;;  %v2081_v17 = vsub.f32 -1e+30, %v2073_v25  ;;  %v2080_v19 = vsub.f32 -1e+30, %v2072_v4 }
 0x5ca   : > { %v1345_v32 = vcombine.low %v1321_v21, %v1337_v44  ;;  %v1346_v52 = vcombine.high %v1321_v21, %v1337_v44  ;;  %v1347_v53 = vcombine.low %v1328_v35, %v1344_v48  ;;  %v1348_v56 = vcombine.high %v1328_v35, %v1344_v48  ;;  %3434 = vmatprep.mubr.msk.f32.mxu1 %vm1538_vm3, %v3615_v33  ;;  %v3617_v57 = vpop.eup %3616 }
 0x5cb   : > { %v2140_v26 = vsel %vm1538_vm3, %v3615_v33, 0.0  ;;  %v2152_v41 = vsel %vm1538_vm3, %v3617_v57, 0.0  ;;  %v2084_v20 = vsub.f32 -1e+30, %v2076_v42  ;;  %v2092_v35 = vmul.f32 1.442695, %v2081_v17 }
 0x5cc   : > { %2150 = vadd.xlane.f32.xlu0 %v2149_v50  ;;  %1659 = vst.msk [vmem:[#allocation4] sm:$0xff] %vm1538_vm3, %v1345_v32  ;;  %1661 = vst.msk [vmem:[#allocation4 + $0x10] sm:$0xff] %vm1538_vm3, %v1346_v52  ;;  %2141 = vadd.xlane.f32.xlu1 %v2140_v26  ;;  %v2090_v44 = vmul.f32 1.442695, %v2080_v19 }
 0x5cd   : > { %1663 = vst.msk [vmem:[#allocation4 + $0x20] sm:$0xff] %vm1538_vm3, %v1347_v53  ;;  %1665 = vst.msk [vmem:[#allocation4 + $0x30] sm:$0xff] %vm1538_vm3, %v1348_v56  ;;  %v2098_v50 = vmul.f32 1.442695, %v2084_v20 }
 0x5d0   : > { %2153 = vadd.xlane.f32.xlu1 %v2152_v41 }
 0x5d3   : > { %v1690_v3 = vld [vmem:[#allocation4] sm:$0xff]  ;;  %v1692_v37 = vld [vmem:[#allocation4 + $0x10] sm:$0xff] }
 0x5d4   : > { %3425 = vmatprep.subr.mxu0 %v1690_v3  ;;  %3432 = vmatprep.subr.mxu1 %v1692_v37  ;;  %v1694_v59 = vld [vmem:[#allocation4 + $0x20] sm:$0xff]  ;;  %v1696_v60 = vld [vmem:[#allocation4 + $0x30] sm:$0xff] }
 0x5d5   : > { %3426 = vmatpush3.msra.mxu0 %v1690_v3  ;;  %3433 = vmatpush3.msra.mxu1 %v1692_v37 }
 0x5d6   : > { %3428 = vmatmul.mubr.msk.f32.vlgmr.msra.gmra.mxu0 %vm1538_vm3, %v4561_v27  ;;  %3435 = vmatmul.mubr.msk.f32.vlgmr.msra.gmra.mxu1 %vm1538_vm3, %v4585_v58 }
 0x5d7   : > { %3437 = vmatprep.subr.mxu0 %v1695_v39  ;;  %3444 = vmatprep.subr.mxu1 %v1697_v1 }
 0x5d8   : > { %3438 = vmatpush3.msra.mxu0 %v1695_v39  ;;  %3441 = vmatprep.mubr.msk.f32.mxu0 %vm1538_vm3, %v3611_v12 }
 0x5d9   : > { %3445 = vmatpush3.msra.mxu1 %v1697_v1  ;;  %3448 = vmatprep.mubr.msk.f32.mxu1 %vm1538_vm3, %v3617_v57 }
 0x5da   : > { %3439 = vmatprep.subr.mxu0 %v1694_v59  ;;  %3446 = vmatprep.subr.mxu1 %v1696_v60 }
 0x5db   : > { %3440 = vmatpush3.msra.mxu0 %v1694_v59  ;;  %3447 = vmatpush3.msra.mxu1 %v1696_v60 }
 0x5dc   : > { %3442 = vmatmul.mubr.msk.f32.vlgmr.msra.gmra.mxu0 %vm1538_vm3, %v3613_v31 }
 0x5ea   : > { %v2069_v27 = vpop.xlane.xlu0 %2068 }
 0x5eb   : > { %v2077_v58 = vmax.f32 %v2069_v27, -1e+30 }
 0x5ed   : > { %v2109_v36 = vsub.f32 %v4538_v29, %v2077_v58  ;;  %v2082_v29 = vsub.f32 -1e+30, %v2074_v28  ;;  %v2085_v38 = vsub.f32 -1e+30, %v2077_v58 }
 0x5ef   : > { %v2124_v40 = vmul.f32 1.442695, %v2109_v36  ;;  %v2094_v6 = vmul.f32 1.442695, %v2082_v29  ;;  %v2100_v31 = vmul.f32 1.442695, %v2085_v38 }
 0x5f1   : > { %3618 = vpow2.f32 %v2124_v40 }
 0x5f2   : > { %3620 = vpow2.f32 %v2088_v63 }
 0x5f3   : > { %3622 = vpow2.f32 %v2096_v0 }
 0x5f4   : > { %3624 = vpow2.f32 %v2086_v5 }
 0x5f5   : > { %3626 = vpow2.f32 %v2094_v6 }
 0x5fe   : > { %v3619_v54 = vpop.eup %3618 }
 0x5ff   : > { %3449 = vmatmul.mubr.msk.f32.vlgmr.msra.gmra.mxu1 %vm1538_vm3, %v3619_v54  ;;  %v2155_v61 = vsel %vm1538_vm3, %v3619_v54, 0.0  ;;  %v3621_v23 = vpop.eup %3620 }
 0x600   : > { %2156 = vadd.xlane.f32.xlu1 %v2155_v61  ;;  %3023 = vmatprep.mubr.f32.mxu1 %v3854_v13  ;;  %v3623_v30 = vpop.eup %3622  ;;  %v2127_v15 = vmul.f32 0.0, %v3621_v23 }
 0x601   : > { %v3625_v46 = vpop.eup %3624  ;;  %v2131_v9 = vmul.f32 0.0, %v3623_v30 }
 0x602   : > { %v3627_v8 = vpop.eup %3626  ;;  %v2126_v28 = vmul.f32 0.0, %v3625_v46 }
 0x603   : > { %v2130_v10 = vmul.f32 0.0, %v3627_v8 }
 0x63c   : > { %v2139_v7 = vpop.xlane.xlu0 %2138 }
 0x63d   : > { %v2159_v24 = vadd.f32 %v2139_v7, %v2127_v15 }
 0x63f   : > { %3628 = vrcp.f32 %v2159_v24 }
 0x640   : > { %v2136_v16 = vpop.xlane.xlu0 %2135 }
 0x641   : > { %v2158_v51 = vadd.f32 %v2136_v16, %v2126_v28 }
 0x644   : > { %v2145_v47 = vpop.xlane.xlu1 %2144 }
 0x64c   : > { %v3629_v32 = vpop.eup %3628 }
 0x651   : > { %v2148_v14 = vpop.xlane.xlu0 %2147 }
 0x652   : > { %v2162_v12 = vadd.f32 %v2148_v14, %v2130_v10 }
 0x655   : > { %v2151_v18 = vpop.xlane.xlu0 %2150  ;;  %v2142_v39 = vpop.xlane.xlu1 %2141 }
 0x656   : > { %v2163_v11 = vadd.f32 %v2151_v18, %v2131_v9 }
 0x658   : > { %3630 = vrcp.f32 %v2163_v11 }
 0x659   : > { %3632 = vrcp.f32 %v2158_v51  ;;  %v2154_v60 = vpop.xlane.xlu1 %2153 }
 0x65a   : > { %3634 = vrcp.f32 %v2162_v12 }
 0x65b   : > { %3636 = vpow2.f32 %v2092_v35 }
 0x65c   : > { %3638 = vpow2.f32 %v2100_v31 }
 0x65d   : > { %3640 = vpow2.f32 %v2090_v44 }
 0x65e   : > { %3642 = vpow2.f32 %v2098_v50 }
 0x665   : > { %v3631_v25 = vpop.eup %3630 }
 0x666   : > { %v3633_v56 = vpop.eup %3632 }
 0x667   : > { %v3635_v26 = vpop.eup %3634 }
 0x668   : > { %v3637_v27 = vpop.eup %3636 }
 0x669   : > { %v3639_v58 = vpop.eup %3638  ;;  %v2129_v54 = vmul.f32 0.0, %v3637_v27 }
 0x66a   : > { %v3641_v36 = vpop.eup %3640  ;;  %v2133_v45 = vmul.f32 0.0, %v3639_v58 }
 0x66b   : > { %v3643_v40 = vpop.eup %3642  ;;  %v2161_v43 = vadd.f32 %v2145_v47, %v2129_v54  ;;  %v2128_v62 = vmul.f32 0.0, %v3641_v36 }
 0x66c   : > { %v2132_v29 = vmul.f32 0.0, %v3643_v40 }
 0x66d   : > { %v2160_v0 = vadd.f32 %v2142_v39, %v2128_v62  ;;  %3644 = vrcp.f32 %v2161_v43 }
 0x66e   : > { %v2164_v5 = vadd.f32 %v2154_v60, %v2132_v29 }
 0x67a   : > { %v3645_v23 = vpop.eup %3644 }
 0x689   : > { %v2157_v61 = vpop.xlane.xlu1 %2156 }
 0x68a   : > { %v2165_v63 = vadd.f32 %v2157_v61, %v2133_v45  ;;  %v2828_v61 = vld [vmem:[%s4829_s2 + $0x30] sm:$0xff] }
 0x68c   : > { %3646 = vrcp.f32 %v2165_v63 }
 0x68d   : > { %3648 = vrcp.f32 %v2160_v0 }
 0x68e   : > { %3650 = vrcp.f32 %v2164_v5 }
 0x696   : > { %v3429_v2 = vpop.f32.mrf.mxu0  ;;  %v3436_v6 = vpop.f32.mrf.mxu1 }
 0x697   : > { %v2491_v48 = vadd.f32 %v3429_v2, %v2127_v15  ;;  %v2493_v16 = vadd.f32 %v3436_v6, %v2129_v54 }
 0x698   : > { %v2238_v21 = vpop.f32.mrf.mxu0  ;;  %v2319_v7 = vpop.f32.mrf.mxu1 }
 0x699   : > { %v2490_v52 = vadd.f32 %v2238_v21, %v2126_v28  ;;  %v2507_v4 = vmul.f32 %v3629_v32, %v2491_v48  ;;  %v2492_v30 = vadd.f32 %v2319_v7, %v2128_v62  ;;  %v3647_v8 = vpop.eup %3646 }
 0x69a   : > { %v3649_v18 = vpop.eup %3648 }
 0x69b   : > { %v2506_v57 = vmul.f32 %v3633_v56, %v2490_v52  ;;  %v2508_v11 = vmul.f32 %v3649_v18, %v2492_v30 }
 0x69c   : > { %v3443_v33 = vpop.f32.mrf.mxu0 }
 0x69d   : > { %v2495_v34 = vadd.f32 %v3443_v33, %v2131_v9  ;;  %v2509_v9 = vmul.f32 %v3645_v23, %v2493_v16 }
 0x69e   : > { %v2400_v53 = vpop.f32.mrf.mxu0 }
 0x69f   : > { %v2511_v22 = vmul.f32 %v3631_v25, %v2495_v34  ;;  %v2494_v42 = vadd.f32 %v2400_v53, %v2130_v10  ;;  %v3651_v10 = vpop.eup %3650  ;;  %v2829_v25 = vld [vmem:[%s4829_s2 + $0x38] sm:$0xff] }
 0x6a0   : > { %3451 = vmatprep.subr.mxu0 %v2829_v25 }
 0x6a1   : > { %v2582_v41 = vcombine.low %v2507_v4, %v2511_v22  ;;  %v2583_v3 = vcombine.high %v2507_v4, %v2511_v22  ;;  %v2510_v37 = vmul.f32 %v3635_v26, %v2494_v42  ;;  %3452 = vmatpush3.msra.mxu0 %v2829_v25 }
 0x6a2   : > { %3453 = vmatprep.subr.mxu0 %v2828_v61 }
 0x6a3   : > { %v2514_v1 = vcombine.low %v2506_v57, %v2510_v37  ;;  %v2515_v59 = vcombine.high %v2506_v57, %v2510_v37  ;;  %v2590_v38 = vrot.slane %v2582_v41, %v4163_v49  ;;  %v2597_v2 = vrot.slane %v2583_v3, %v4163_v49  ;;  %3454 = vmatpush3.msra.mxu0 %v2828_v61  ;;  %v2952_v61 = vld [vmem:[#allocation9 + $0x78] sm:$0xff] }
 0x6a4   : > { %2975 = vmatprep.subr.mxu1 %v2952_v61 }
 0x6a5   : > { %v2522_v33 = vrot.slane %v2514_v1, %v4163_v49  ;;  %v2529_v32 = vrot.slane %v2515_v59, %v4163_v49 }
 0x6bf   : > { %v3450_v14 = vpop.f32.mrf.mxu1 }
 0x6c0   : > { %v2497_v46 = vadd.f32 %v3450_v14, %v2133_v45  ;;  %v2827_v45 = vld [vmem:[%s4829_s2 + $0x28] sm:$0xff] }
 0x6c1   : > { %v2481_v15 = vpop.f32.mrf.mxu1  ;;  %3455 = vmatprep.subr.mxu0 %v2827_v45 }
 0x6c2   : > { %v2513_v24 = vmul.f32 %v3647_v8, %v2497_v46  ;;  %v2496_v28 = vadd.f32 %v2481_v15, %v2132_v29  ;;  %3456 = vmatpush3.msra.mxu0 %v2827_v45  ;;  %v2951_v45 = vld [vmem:[#allocation9 + $0x70] sm:$0xff] }
 0x6c3   : > { %2976 = vmatpush1.msra.mxu1 %v2951_v45 }
 0x6c4   : > { %v2598_v51 = vcombine.low %v2509_v9, %v2513_v24  ;;  %v2599_v12 = vcombine.high %v2509_v9, %v2513_v24  ;;  %v2512_v17 = vmul.f32 %v3651_v10, %v2496_v28  ;;  %v2826_v9 = vld [vmem:[%s4829_s2 + $0x20] sm:$0xff]  ;;  %v2825_v24 = vld [vmem:[%s4829_s2 + $0x18] sm:$0xff] }
 0x6c5   : > { %3457 = vmatprep.subr.mxu0 %v2826_v9 }
 0x6c6   : > { %v2606_v19 = vrot.slane %v2598_v51, %v4163_v49  ;;  %v2613_v20 = vrot.slane %v2599_v12, %v4163_v49  ;;  %v2530_v21 = vcombine.low %v2508_v11, %v2512_v17  ;;  %v2531_v35 = vcombine.high %v2508_v11, %v2512_v17  ;;  %3458 = vmatpush3.msra.mxu0 %v2826_v9 }
 0x6c7   : > { %3459 = vmatprep.subr.mxu0 %v2825_v24 }
 0x6c8   : > { %v2614_v31 = vcombine.low %v2590_v38, %v2606_v19  ;;  %v2615_v44 = vcombine.high %v2590_v38, %v2606_v19  ;;  %v2630_v48 = vcombine.low %v2597_v2, %v2613_v20  ;;  %v2631_v50 = vcombine.high %v2597_v2, %v2613_v20  ;;  %3460 = vmatpush3.msra.mxu0 %v2825_v24 }
 0x6c9   : > { %v2538_v52 = vrot.slane %v2530_v21, %v4163_v49  ;;  %v2545_v34 = vrot.slane %v2531_v35, %v4163_v49  ;;  %v2824_v35 = vld [vmem:[%s4829_s2 + $0x10] sm:$0xff] }
 0x6ca   : > { %v2622_v53 = vrot.slane %v2614_v31, %v4167_v55  ;;  %v2629_v56 = vrot.slane %v2615_v44, %v4167_v55  ;;  %v2638_v47 = vrot.slane %v2630_v48, %v4167_v55  ;;  %v2645_v4 = vrot.slane %v2631_v50, %v4167_v55  ;;  %3461 = vmatprep.subr.mxu0 %v2824_v35 }
 0x6cb   : > { %v2546_v22 = vcombine.low %v2522_v33, %v2538_v52  ;;  %v2547_v42 = vcombine.high %v2522_v33, %v2538_v52  ;;  %v2562_v26 = vcombine.low %v2529_v32, %v2545_v34  ;;  %v2563_v57 = vcombine.high %v2529_v32, %v2545_v34  ;;  %v2823_v33 = vld [vmem:[%s4829_s2 + $0x8] sm:$0xff]  ;;  %3462 = vmatpush3.msra.mxu0 %v2824_v35  ;;  %v3063_v35 = vld [vmem:[%s4831_s4 + $0x58] sm:$0xff] }
 0x6cc   : > { %v2718_v41 = vcombine.low %v2622_v53, %v2629_v56  ;;  %v3319_v3 = vcombine.high %v2622_v53, %v2629_v56  ;;  %v2734_v37 = vcombine.low %v2638_v47, %v2645_v4  ;;  %v3320_v39 = vcombine.high %v2638_v47, %v2645_v4  ;;  %3463 = vmatprep.subr.mxu0 %v2823_v33 }
 0x6cd   : > { %v2554_v1 = vrot.slane %v2546_v22, %v4167_v55  ;;  %v2561_v59 = vrot.slane %v2547_v42, %v4167_v55  ;;  %v2570_v60 = vrot.slane %v2562_v26, %v4167_v55  ;;  %v2577_v27 = vrot.slane %v2563_v57, %v4167_v55  ;;  %3464 = vmatpush3.msra.mxu0 %v2823_v33  ;;  %v3058_v33 = vld [vmem:[%s4831_s4 + $0x30] sm:$0xff] }
 0x6ce   : > { %v2725_v58 = vrot.slane %v2718_v41, %v4163_v49  ;;  %v2733_v36 = vrot.slane %v3319_v3, %v4163_v49  ;;  %v2741_v40 = vrot.slane %v2734_v37, %v4163_v49  ;;  %v2749_v54 = vrot.slane %v3320_v39, %v4163_v49  ;;  %v3664_v39 = vld [vmem:[%s4069_s29 + $0x8] sm:$0xff] }
 0x6cf   : > { %v2650_v43 = vcombine.low %v2554_v1, %v2561_v59  ;;  %v3317_v62 = vcombine.high %v2554_v1, %v2561_v59  ;;  %v2666_v29 = vcombine.low %v2570_v60, %v2577_v27  ;;  %v3318_v63 = vcombine.high %v2570_v60, %v2577_v27  ;;  %v3665_v60 = vld [vmem:[%s4069_s29] sm:$0xff]  ;;  %s3334_s29 = sshll.u32 %s3940_s13, 8  ;;  %s3148_s13 = scalar_lea.sflag [#allocation8], %s4063_s7 }
 0x6d0   : > { %v2751_v0 = vcombine.high %v2725_v58, %v2733_v36  ;;  %v2767_v5 = vcombine.high %v2741_v40, %v2749_v54  ;;  %v2750_v6 = vcombine.low %v2725_v58, %v2733_v36  ;;  %v2766_v7 = vcombine.low %v2741_v40, %v2749_v54  ;;  %s4782_s20 = scalar_lea.hbm %s4836_s9, %s3334_s29 }
 0x6d1   : > { %v2657_v16 = vrot.slane %v2650_v43, %v4163_v49  ;;  %v2665_v14 = vrot.slane %v3317_v62, %v4163_v49  ;;  %v2673_v23 = vrot.slane %v2666_v29, %v4163_v49  ;;  %v2681_v30 = vrot.slane %v3318_v63, %v4163_v49  ;;  %v2950_v43 = vld [vmem:[#allocation9 + $0x68] sm:$0xff]  ;;  %v2949_v62 = vld [vmem:[#allocation9 + $0x60] sm:$0xff]  ;;  %v2948_v29 = vld [vmem:[#allocation9 + $0x58] sm:$0xff] }
 0x6d2   : > { %v2765_v46 = vrot.slane %v2751_v0, %v4167_v55  ;;  %v2781_v8 = vrot.slane %v2767_v5, %v4167_v55  ;;  %v2758_v15 = vrot.slane %v2750_v6, %v4167_v55  ;;  %v2774_v18 = vrot.slane %v2766_v7, %v4167_v55  ;;  %2977 = vmatprep.subr.mxu1 %v2950_v43  ;;  %v2947_v63 = vld [vmem:[#allocation9 + $0x50] sm:$0xff]  ;;  %v2946_v0 = vld [vmem:[#allocation9 + $0x48] sm:$0xff]  ;;  %v2945_v5 = vld [vmem:[#allocation9 + $0x40] sm:$0xff] }
 0x6d3   : > { %v2682_v28 = vcombine.low %v2657_v16, %v2665_v14  ;;  %v2698_v49 = vcombine.low %v2673_v23, %v2681_v30  ;;  %v2683_v10 = vcombine.high %v2657_v16, %v2665_v14  ;;  %v2699_v11 = vcombine.high %v2673_v23, %v2681_v30  ;;  %2978 = vmatpush1.msra.mxu1 %v2949_v62  ;;  %v2944_v6 = vld [vmem:[#allocation9 + $0x38] sm:$0xff]  ;;  %v2943_v7 = vld [vmem:[#allocation9 + $0x30] sm:$0xff]  ;;  %v2942_v16 = vld [vmem:[#allocation9 + $0x28] sm:$0xff] }
 0x6d4   : > { %v2784_v51 = vcombine.low %v2765_v46, %v2781_v8  ;;  %v2783_v12 = vcombine.high %v2758_v15, %v2774_v18  ;;  %v2785_v17 = vcombine.high %v2765_v46, %v2781_v8  ;;  %v2782_v38 = vcombine.low %v2758_v15, %v2774_v18  ;;  %2979 = vmatprep.subr.mxu1 %v2948_v29  ;;  %v2941_v14 = vld [vmem:[#allocation9 + $0x20] sm:$0xff]  ;;  %v2940_v23 = vld [vmem:[#allocation9 + $0x18] sm:$0xff]  ;;  %v2939_v30 = vld [vmem:[#allocation9 + $0x10] sm:$0xff] }
 0x6d5   : > { %v2690_v2 = vrot.slane %v2682_v28, %v4167_v55  ;;  %v2706_v19 = vrot.slane %v2698_v49, %v4167_v55  ;;  %v2697_v20 = vrot.slane %v2683_v10, %v4167_v55  ;;  %v2713_v21 = vrot.slane %v2699_v11, %v4167_v55  ;;  %v2822_v55 = vld [vmem:[%s4829_s2] sm:$0xff]  ;;  %2980 = vmatpush1.msra.mxu1 %v2947_v63  ;;  %v2938_v46 = vld [vmem:[#allocation9 + $0x8] sm:$0xff]  ;;  %v2937_v8 = vld [vmem:[#allocation9] sm:$0xff] }
 0x6d6   : > { %2798 = vrot.lane.b32.xlu0 %v2784_v51, %s3865_s19  ;;  %2790 = vrot.lane.b32.xlu1 %v2783_v12, %s3861_s14  ;;  %v3323_v12 = vld [vmem:[%s4833_s6] ss:$0 sm:$0xff] }
 0x6d7   : > { %v2715_v31 = vcombine.high %v2690_v2, %v2706_v19  ;;  %v2716_v44 = vcombine.low %v2697_v20, %v2713_v21  ;;  %v2717_v48 = vcombine.high %v2697_v20, %v2713_v21  ;;  %v2714_v50 = vcombine.low %v2690_v2, %v2706_v19  ;;  %3465 = vmatprep.subr.mxu0 %v2822_v55  ;;  %v3067_v19 = vld [vmem:[%s4831_s4 + $0x78] sm:$0xff]  ;;  %v3066_v20 = vld [vmem:[%s4831_s4 + $0x70] sm:$0xff]  ;;  %v3065_v21 = vld [vmem:[%s4831_s4 + $0x68] sm:$0xff] }
 0x6d8   : > { %3466 = vmatpush3.msra.mxu0 %v2822_v55  ;;  %2981 = vmatprep.subr.mxu1 %v2946_v0  ;;  %v3057_v55 = vld [vmem:[%s4831_s4 + $0x28] sm:$0xff] }
 0x6d9   : > { %2982 = vmatpush1.msra.mxu1 %v2945_v5  ;;  %3470 = vmatprep.subr.mxu0 %v3067_v19 }
 0x6da   : > { %2788 = vrot.lane.b32.xlu0 %v2715_v31, %s3861_s14  ;;  %2796 = vrot.lane.b32.xlu1 %v2716_v44, %s3865_s19  ;;  %v3062_v31 = vld [vmem:[%s4831_s4 + $0x50] sm:$0xff]  ;;  %v3061_v44 = vld [vmem:[%s4831_s4 + $0x48] sm:$0xff]  ;;  %s3778_s19 = scalar_lea.vmem %s3777_s27, 512 }
 0x6db   : > { %2983 = vmatprep.subr.mxu1 %v2944_v6 }
 0x6dc   : > { %2984 = vmatpush1.msra.mxu1 %v2943_v7 }
 0x6dd   : > { %2985 = vmatprep.subr.mxu1 %v2942_v16 }
 0x6de   : > { %2806 = vrot.lane.b32.xlu0 %v2785_v17, %s3866_s15  ;;  %2804 = vrot.lane.b32.xlu1 %v2717_v48, %s3866_s15  ;;  %v3060_v48 = vld [vmem:[%s4831_s4 + $0x40] sm:$0xff]  ;;  %s3161_s15 = sshll.u32 %s394_s25, 4  ;;  %s4775_s15 = int_to_ptr.vmem [resolvable:$true] %s3161_s15 }
 0x6df   : > { %2986 = vmatpush1.msra.mxu1 %v2941_v14  ;;  %s3772_s8 = scalar_lea.vmem %s4775_s15, 256  ;;  %p3779_p1 = scmp.lt.s32.totalorder %s4775_s15, %s3777_s27 }
 0x6e0   : > { %2987 = vmatprep.subr.mxu1 %v2940_v23  ;;  %p3773_p12 = scmp.ne.s32.totalorder %s4775_s15, %s3772_s8  ;;  %p3780_p2 = scmp.lt.s32.totalorder %s3778_s19, %s3772_s8 }
 0x6e1   : > { %2988 = vmatpush1.msra.mxu1 %v2939_v30 }
 0x6e2   : > { %2989 = vmatprep.subr.mxu1 %v2938_v46  ;;  %p3774_p5 = pnand %p3773_p12, %p4864_p0  ;;  %p3781_p3 = por %p3780_p2, %p3779_p1 }
 0x6e3   : > { %2990 = vmatpush1.msra.mxu1 %v2937_v8 }
 0x6e4   : > { %p3775_p10 = pneg %p3774_p5 }
 0x6e6   : > { %p3782_p9 = pnand %p3781_p3, %p3775_p10 }
 0x748   : > { %v2799_v32 = vpop.permute.xlu0 %2798  ;;  %v2791_v52 = vpop.permute.xlu1 %2790 }
 0x749   : > { %v2811_v53 = vsel %vm1538_vm3, %v2782_v38, %v2791_v52  ;;  %v3055_v52 = vld [vmem:[%s4831_s4 + $0x18] sm:$0xff] }
 0x74a   : > { %v2814_v22 = vsel %vm2812_vm6, %v2811_v53, %v2799_v32  ;;  %v3056_v32 = vld [vmem:[%s4831_s4 + $0x20] sm:$0xff] }
 0x74b   : > { %v3052_v53 = vld [vmem:[%s4831_s4] sm:$0xff] }
 0x74c   : > { %v2789_v34 = vpop.permute.xlu0 %2788  ;;  %v2797_v25 = vpop.permute.xlu1 %2796 }
 0x74d   : > { %v2810_v56 = vsel %vm1538_vm3, %v2714_v50, %v2789_v34  ;;  %v3059_v50 = vld [vmem:[%s4831_s4 + $0x38] sm:$0xff]  ;;  %v3054_v34 = vld [vmem:[%s4831_s4 + $0x10] sm:$0xff] }
 0x74e   : > { %v2813_v47 = vsel %vm2812_vm6, %v2810_v56, %v2797_v25  ;;  %v3053_v25 = vld [vmem:[%s4831_s4 + $0x8] sm:$0xff] }
 0x750   : > { %v2807_v4 = vpop.permute.xlu0 %2806  ;;  %v2805_v42 = vpop.permute.xlu1 %2804 }
 0x751   : > { %v2817_v26 = vsel %vm2815_vm7, %v2814_v22, %v2807_v4  ;;  %v2816_v57 = vsel %vm2815_vm7, %v2813_v47, %v2805_v42 }
 0x752   : > { %2819 = vst.msk [vmem:[#allocation5 + $0x8] sm:$0xff] %vm414_vm0, %v2817_v26  ;;  %2818 = vst.msk [vmem:[#allocation5] sm:$0xff] %vm414_vm0, %v2816_v57 }
 0x759   : > { %v2820_v41 = vld [vmem:[#allocation5] sm:$0xff]  ;;  %v2821_v3 = vld [vmem:[#allocation5 + $0x8] sm:$0xff] }
 0x75a   : > { %3467 = vmatprep.mubr.msk.f32.mxu0 %vm414_vm0, %v2820_v41 }
 0x75b   : > { %3468 = vmatmul.mubr.msk.f32.vlgmr.msra.gmra.mxu0 %vm414_vm0, %v2821_v3 }
 0x75c   : > { %3471 = vmatpush3.msra.mxu0 %v3067_v19 }
 0x75d   : > { %3472 = vmatprep.subr.mxu0 %v3066_v20 }
 0x75e   : > { %3473 = vmatpush3.msra.mxu0 %v3066_v20 }
 0x75f   : > { %3474 = vmatprep.subr.mxu0 %v3065_v21 }
 0x760   : > { %3475 = vmatpush3.msra.mxu0 %v3065_v21 }
 0x81b   : > { %v3469_v37 = vpop.f32.mrf.mxu0 }
 0x81c   : > { %v4704_v1 = vadd.f32 %v3664_v39, %v3469_v37 }
 0x81d   : > { %v2902_v59 = vpop.f32.mrf.mxu0 }
 0x81e   : > { %v4707_v27 = vadd.f32 %v3665_v60, %v2902_v59  ;;  %v2914_v58 = vmul.f32 %v4704_v1, %v4704_v1 }
 0x820   : > { %v2918_v36 = vsel %vm414_vm0, %v2914_v58, 0.0  ;;  %v2913_v40 = vmul.f32 %v4707_v27, %v4707_v27 }
 0x821   : > { %2919 = vadd.xlane.f32.xlu0 %v2918_v36 }
 0x822   : > { %v2915_v54 = vsel %vm414_vm0, %v2913_v40, 0.0 }
 0x823   : > { %2916 = vadd.xlane.f32.xlu1 %v2915_v54 }
 0x8aa   : > { %v2920_v15 = vpop.xlane.xlu0 %2919 }
 0x8ab   : > { %v2922_v18 = vmul.f32 0.015625, %v2920_v15 }
 0x8ac   : > { %v2917_v9 = vpop.xlane.xlu1 %2916 }
 0x8ad   : > { %v2924_v24 = vadd.f32 1e-05, %v2922_v18  ;;  %v2921_v28 = vmul.f32 0.015625, %v2917_v9 }
 0x8af   : > { %v2923_v49 = vadd.f32 1e-05, %v2921_v28  ;;  %3652 = vrsqrt.f32 %v2924_v24 }
 0x8b1   : > { %3654 = vrsqrt.f32 %v2923_v49 }
 0x8bc   : > { %v3653_v10 = vpop.eup %3652 }
 0x8bd   : > { %v2928_v38 = vmul.f32 %v3653_v10, %v4704_v1 }
 0x8be   : > { %v3655_v11 = vpop.eup %3654 }
 0x8bf   : > { %v2927_v51 = vmul.f32 %v3655_v11, %v4707_v27  ;;  %v2936_v2 = vmul.f32 %v3323_v12, %v2928_v38 }
 0x8c1   : > { %v2935_v17 = vmul.f32 %v3323_v12, %v2927_v51 }
 0x8c3   : > { %3324 = vmatmul.mubr.msk.f32.vlgmr.msra.gmra.mxu1 %vm414_vm0, %v2935_v17 }
 0x8c4   : > { %3029 = vmatprep.mubr.f32.mxu1 %v3854_v13  ;;  %v3064_v13 = vld [vmem:[%s4831_s4 + $0x60] sm:$0xff] }
 0x8c5   : > { %3476 = vmatprep.subr.mxu0 %v3064_v13 }
 0x8c6   : > { %3477 = vmatpush3.msra.mxu0 %v3064_v13 }
 0x8c7   : > { %3325 = vmatmul.mubr.msk.f32.gmra.mxu1 %vm414_vm0, %v2936_v2  ;;  %3478 = vmatprep.subr.mxu0 %v3063_v35 }
 0x8c8   : > { %3479 = vmatpush3.msra.mxu0 %v3063_v35 }
 0x8c9   : > { %3480 = vmatprep.subr.mxu0 %v3062_v31 }
 0x8ca   : > { %3481 = vmatpush3.msra.mxu0 %v3062_v31 }
 0x8cb   : > { %3482 = vmatprep.subr.mxu0 %v3061_v44 }
 0x8cc   : > { %3483 = vmatpush3.msra.mxu0 %v3061_v44 }
 0x8cd   : > { %3484 = vmatprep.subr.mxu0 %v3060_v48 }
 0x8ce   : > { %3485 = vmatpush3.msra.mxu0 %v3060_v48 }
 0x8cf   : > { %3486 = vmatprep.subr.mxu0 %v3059_v50 }
 0x8d0   : > { %3487 = vmatpush3.msra.mxu0 %v3059_v50 }
 0x8d1   : > { %3488 = vmatprep.subr.mxu0 %v3058_v33 }
 0x8d2   : > { %3489 = vmatpush3.msra.mxu0 %v3058_v33 }
 0x8d3   : > { %3490 = vmatprep.subr.mxu0 %v3057_v55 }
 0x8d4   : > { %3491 = vmatpush3.msra.mxu0 %v3057_v55 }
 0x8d5   : > { %3492 = vmatprep.subr.mxu0 %v3056_v32 }
 0x8d6   : > { %3493 = vmatpush3.msra.mxu0 %v3056_v32 }
 0x8d7   : > { %3494 = vmatprep.subr.mxu0 %v3055_v52 }
 0x8d8   : > { %3495 = vmatpush3.msra.mxu0 %v3055_v52 }
 0x8d9   : > { %3496 = vmatprep.subr.mxu0 %v3054_v34 }
 0x8da   : > { %3497 = vmatpush3.msra.mxu0 %v3054_v34 }
 0x8db   : > { %3498 = vmatprep.subr.mxu0 %v3053_v25 }
 0x8dc   : > { %3499 = vmatpush3.msra.mxu0 %v3053_v25 }
 0x8dd   : > { %3500 = vmatprep.subr.mxu0 %v3052_v53 }
 0x8de   : > { %3501 = vmatpush3.msra.mxu0 %v3052_v53 }
 0x983   : > { %v3025_v56 = vpop.f32.mrf.mxu1 }
 0x984   : > { %v3326_v47 = vmul.f32 -1.442695, %v3025_v56 }
 0x985   : > { %v3027_v4 = vpop.f32.mrf.mxu1 }
 0x986   : > { %3656 = vpow2.f32 %v3326_v47 }
 0x987   : > { %v3031_v22 = vpop.f32.mrf.mxu1 }
 0x988   : > { %v3327_v42 = vmul.f32 -1.442695, %v3031_v22 }
 0x989   : > { %v3033_v36 = vpop.f32.mrf.mxu1 }
 0x98a   : > { %3658 = vpow2.f32 %v3327_v42 }
 0x993   : > { %v3657_v26 = vpop.eup %3656 }
 0x994   : > { %v3042_v57 = vadd.f32 1.0, %v3657_v26 }
 0x996   : > { %3660 = vrcp.f32 %v3042_v57 }
 0x997   : > { %v3659_v41 = vpop.eup %3658 }
 0x998   : > { %v3043_v3 = vadd.f32 1.0, %v3659_v41 }
 0x99a   : > { %3662 = vrcp.f32 %v3043_v3 }
 0x9a3   : > { %v3661_v37 = vpop.eup %3660 }
 0x9a4   : > { %v3048_v39 = vmul.f32 %v3661_v37, %v3025_v56 }
 0x9a6   : > { %v3050_v59 = vmul.f32 %v3048_v39, %v3027_v4 }
 0x9a7   : > { %v3663_v60 = vpop.eup %3662 }
 0x9a8   : > { %v3049_v58 = vmul.f32 %v3663_v60, %v3031_v22  ;;  %3502 = vmatprep.mubr.f32.mxu0 %v3050_v59 }
 0x9aa   : > { %v3051_v40 = vmul.f32 %v3049_v58, %v3033_v36 }
 0x9ac   : > { %3503 = vmatmul.mubr.f32.vlgmr.msra.gmra.mxu0 %v3051_v40 }
 0xa6c   : > { %v3504_v54 = vpop.f32.mrf.mxu0 }
 0xa6d   : > { %v3144_v61 = vadd.f32 %v3504_v54, %v4704_v1 }
 0xa6e   : > { %v3134_v45 = vpop.f32.mrf.mxu0 }
 0xa6f   : > { %3146 = vst.msk [vmem:[%s394_s25 + $0x8] sm:$0xff] %vm414_vm0, %v3144_v61  ;;  %v3143_v43 = vadd.f32 %v3134_v45, %v4707_v27 }
 0xa71   : > { %3145 = vst.msk [vmem:[%s394_s25] sm:$0xff] %vm414_vm0, %v3143_v43 }
 0xa72   : > { %3785 = shalt.err (!%p3782_p9)
}
 0xa73   : > { %s3786_s21 = scalar_lea.hbm %s4782_s20, 256  ;;  %s3790_s25 = scalar_lea.hbm %s4836_s9, 512 }
 0xa74   : > { %p3787_p7 = scmp.ne.s32.totalorder %s4782_s20, %s3786_s21  ;;  %p3791_p6 = scmp.lt.s32.totalorder %s4782_s20, %s4836_s9 }
 0xa75   : > { %p3792_p11 = scmp.lt.s32.totalorder %s3790_s25, %s3786_s21 }
 0xa76   : > { %p3788_p4 = pnand %p3787_p7, %p4864_p0 }
 0xa77   : > { %p3793_p13 = por %p3792_p11, %p3791_p6 }
 0xa78   : > { %p3789_p8 = pneg %p3788_p4 }
 0xa7a   : > { %p3794_p12 = pnand %p3793_p13, %p3789_p8 }
 0xa7c   : > { %3797 = shalt.err (!%p3794_p12)
}
 0xa7d   : > { %s3868_s17 = smov 128  }
 0xa7e   : > { %3519 = dma.vmem_to_hbm [thread:$0]  (%p4864_p0), %s4775_s15, 256, %s4782_s20, %s3148_s13, %s3868_s17, %s3868_s17, %s3862_s23  }
 0xa7f PF: > { %s3176_s8 = sand.u32 1, %s3832_s30   ;;  %p4865_p5 = scmp.ne.s32.totalorder %s4847_s16, 0 }
 0xa80   : > { %p4866_p10 = scmp.ge.s32.totalorder %s3844_s12, 2  ;;  %s3177_s26 = scalar_lea.sflag [#allocation8], %s3176_s8 }
 0xa82   : > { %p3536_p1 = pnand %p4866_p10, %p4865_p5 }
 0xa84   : > { %p3537_p2 = pneg %p3536_p1 }
 0xa86   : > { %3827 = dma.done.wait (%p3537_p2), %s3177_s26, 256  }
 0xa87   : > { %3829 = vsyncadd (%p3537_p2), %s3177_s26, 4294967040  ;;  %p24_p3 = scmp.ge.s32.totalorder %s3994_s24, 4   ;;  %s4867_s30 = smov %s3836_s10 }
 0xa88   : > { %s4868_s10 = smov %s3840_s11  ;;  %s4869_s11 = smov %s4015_s28 }
 0xa89   : > { %s4870_s12 = smov %s3994_s24  ;;  %26 = sbr.rel (!%p24_p3) target bundleno = 11 (0xb), region = 113 }
 0xa8e   :  { %3182 = vsyncpa [#allocation7], 1 }
 0xa8f   :  { %3184 = vsyncpa [#allocation7 + $0x1], 1 }
 0xa90   :  { %3185 = vsyncpa [#allocation10], 1 }
 0xa91   :  { %3186 = vsyncpa [#allocation13], 1 }
 0xa92   :  { %3187 = vsyncpa [#allocation8], 1 }
 0xa93   :  { %3189 = vsyncpa [#allocation8 + $0x1], 1 }

</bundles_post_ra>
